<compile_context>
chip_gen: v6e
topology: v6e:2x2x1
jax: 0.10.0
libtpu: 0.0.40
codegen_flags: <defaults>
</compile_context>

<pallas_src>
import functools

import jax
import jax.numpy as jnp
from jax.experimental import pallas as pl
from jax.experimental.pallas import tpu as pltpu

LRELU_SLOPE = 0.2
BN_EPS = 1e-5


def _round_up(x, m):
    return ((x + m - 1) // m) * m


# ----------------------------------------------------------------------------
# Fused BetaVAE forward kernel (single invocation, whole batch folded into rows)
# ----------------------------------------------------------------------------
def _make_fused_kernel(*, depth, ksize, pad, batch, seq_len, channels, latent,
                       reduced, recon_w, pad_lead, seg, softplus_eps,
                       compute_dtype):
    B, L, C, K = batch, seq_len, channels, ksize
    r2 = 2 * reduced
    vb = 4 * depth            # first bias row inside the vector slab

    def kernel(x_ref, conv_ref, dense_ref, vec_ref, out_ref, xp_ref):
        def lrelu(v):
            return jnp.where(v > 0, v, LRELU_SLOPE * v)

        def dense(h, w_idx, rows, cols, b_row, act=False):
            w = dense_ref[w_idx, :rows, :cols]
            y = jnp.dot(h.astype(compute_dtype), w,
                        preferred_element_type=jnp.float32)
            y = y + vec_ref[b_row:b_row + 1, :cols]
            return lrelu(y) if act else y

        def conv_bn_lrelu(h, w_idx, ss_row):
            # stride-1 "same" Conv1d (or K-flipped ConvTranspose1d) + folded eval-mode
            # BatchNorm + LeakyReLU(0.2), as ONE im2col MXU dot per layer.
            xp_ref[:, pad_lead:pad_lead + L, :] = h.reshape(B, L, C)
            slab = jnp.concatenate(
                [xp_ref[:, pad_lead - pad + k: pad_lead - pad + k + L, :]
                 for k in range(K)], axis=-1).reshape(B * L, K * C)
            y = jnp.dot(slab.astype(compute_dtype), conv_ref[w_idx],
                        preferred_element_type=jnp.float32)
            scale = vec_ref[ss_row:ss_row + 1, :C]
            shift = vec_ref[ss_row + 1:ss_row + 2, :C]
            return lrelu(y * scale + shift)

        # Zero only the halo rows once; the interior is fully overwritten before
        # every read by each conv layer.
        if pad > 0:
            xp_ref[:, :pad_lead, :] = jnp.zeros((B, pad_lead, C), jnp.float32)
            xp_ref[:, pad_lead + L:, :] = jnp.zeros(
                (B, seg - pad_lead - L, C), jnp.float32)

        # ---------------- Encoder ----------------
        h = x_ref[...].reshape(B * L, C)               # input lane-padded to C channels
        for d in range(depth):
            h = conv_bn_lrelu(h, d, 2 * d)
        h = dense(h, 0, C, latent, vb + 0)             # 1x1 conv -> (B*L, latent)
        h = dense(h, 1, latent, C, vb + 1, act=True)   # fc + LeakyReLU (Dropout = id)
        ml = dense(h, 2, C, r2, vb + 2)                # fused [mu | logvar]

        lane = jax.lax.broadcasted_iota(jnp.int32, ml.shape, 1)
        mustd = jnp.where(lane < reduced, ml,
                          jax.nn.softplus(ml) + softplus_eps)   # [mu | std]

        # Reparameterize (eval mode): z = mu.  The dec_fc weight rows for the logvar
        # half are zero, so ml @ W_pad == mu @ W_dec_fc.
        # TODO(synk): training-mode z = mu + eps*std (torch.randn_like) not implemented.
        h = dense(ml, 3, r2, C, vb + 3, act=True)      # decoder fc + LeakyReLU

        # ---------------- Decoder (gaussian_out=False) ----------------
        for d in range(depth):
            h = conv_bn_lrelu(h, depth + d, 2 * depth + 2 * d)
        recon = dense(h, 4, C, recon_w, vb + 4)        # 1x1 deconv, lane-padded output

        # Single lane-dense store: [mu | std | recon(padded to 128 lanes)].
        out_ref[...] = jnp.concatenate([mustd, recon], axis=-1)

    return kernel


# ----------------------------------------------------------------------------
# Host-side parameter packing into 3 DMA slabs
# ----------------------------------------------------------------------------
def _fold_bn(conv_bias, gamma, beta, rmean, rvar):
    scale = gamma / jnp.sqrt(rvar + BN_EPS)
    shift = beta + (conv_bias - rmean) * scale
    return scale, shift


def _pack_params(params, *, in_channels, channels, latent_dim, reduced,
                 kernel_size, recon_w, vec_w, dense_p, compute_dtype):
    K = kernel_size

    def vec_row(v):
        v = jnp.asarray(v, jnp.float32).reshape(-1)
        return jnp.pad(v, (0, vec_w - v.shape[0]))

    def dense_mat(w):
        w = jnp.asarray(w, jnp.float32)
        return jnp.pad(w, ((0, dense_p - w.shape[0]), (0, dense_p - w.shape[1])))

    conv_mats, ss_rows = [], []

    # Encoder Conv1d stack: torch (Cout, Cin, K) -> im2col (K*channels, channels);
    # layer 0's Cin (= in_channels) is zero-padded to `channels` to match the
    # lane-padded input.
    for layer in params["enc_convs"]:
        w = jnp.transpose(layer["w"], (2, 1, 0))                 # (K, Cin, Cout)
        if w.shape[1] < channels:
            w = jnp.pad(w, ((0, 0), (0, channels - w.shape[1]), (0, 0)))
        conv_mats.append(w.reshape(K * channels, channels))
        scale, shift = _fold_bn(layer["b"], layer["gamma"], layer["beta"],
                                layer["rmean"], layer["rvar"])
        ss_rows += [vec_row(scale), vec_row(shift)]

    # Decoder ConvTranspose1d stack: stride-1 transposed conv == Conv1d with a
    # K-flipped kernel and the same padding.  torch weight (Cin, Cout, K).
    for layer in params["dec_deconvs"]:
        w = jnp.transpose(jnp.flip(layer["w"], axis=-1), (2, 0, 1))   # (K, Cin, Cout)
        conv_mats.append(w.reshape(K * channels, channels))
        scale, shift = _fold_bn(layer["b"], layer["gamma"], layer["beta"],
                                layer["rmean"], layer["rvar"])
        ss_rows += [vec_row(scale), vec_row(shift)]

    # Dense weights, each zero-padded to (dense_p, dense_p), one stacked slab.
    d0 = params["enc_final"]["w"][:, :, 0].T                     # (channels, latent)
    d1 = params["enc_fc"]["w"].T                                 # (latent, channels)
    d2 = jnp.concatenate([params["fc_mu"]["w"].T,
                          params["fc_logvar"]["w"].T], axis=1)   # (channels, 2R)
    d3 = jnp.concatenate([params["dec_fc"]["w"].T,               # (2R, channels),
                          jnp.zeros((reduced, channels), jnp.float32)], axis=0)
    d4 = jnp.pad(params["dec_final"]["w"][:, :, 0],              # (channels, recon_w)
                 ((0, 0), (0, recon_w - in_channels)))
    dense_slab = jnp.stack([dense_mat(d) for d in (d0, d1, d2, d3, d4)]
                           ).astype(compute_dtype)

    bias_rows = [
        vec_row(params["enc_final"]["b"]),
        vec_row(params["enc_fc"]["b"]),
        vec_row(jnp.concatenate([params["fc_mu"]["b"], params["fc_logvar"]["b"]])),
        vec_row(params["dec_fc"]["b"]),
        vec_row(params["dec_final"]["b"]),
    ]

    conv_slab = jnp.stack(conv_mats).astype(compute_dtype)       # (2*depth, K*C, C)
    vec_slab = jnp.stack(ss_rows + bias_rows)                    # (4*depth+5, vec_w)
    return conv_slab, dense_slab, vec_slab


# ----------------------------------------------------------------------------
# Wrapper: one pallas_call for the whole forward pass
# ----------------------------------------------------------------------------
def beta_vae_forward(params, x_ncl, *, kernel_size, softplus_eps=1e-4,
                     compute_dtype=jnp.bfloat16):
    """Eval-mode BetaVAE forward.  x_ncl: (B, in_channels, L) -> (recon, mu, std)."""
    assert kernel_size % 2 == 1, \
        "stride-1 ConvTranspose1d == flipped-kernel Conv1d only holds for odd K, pad=(K-1)//2"
    B, in_ch, L = x_ncl.shape
    pad = (kernel_size - 1) // 2

    depth = len(params["enc_convs"])
    channels = params["enc_convs"][0]["w"].shape[0]
    latent = params["enc_final"]["w"].shape[0]
    reduced = params["fc_mu"]["w"].shape[0]
    r2 = 2 * reduced
    assert in_ch <= channels
    assert latent == reduced, "decoder.fc consumes z = mu directly"

    recon_w = _round_up(in_ch, 128)
    dense_p = max(_round_up(max(channels, latent, r2), 128), recon_w)
    vec_w = dense_p

    conv_slab, dense_slab, vec_slab = _pack_params(
        params, in_channels=in_ch, channels=channels, latent_dim=latent,
        reduced=reduced, kernel_size=kernel_size, recon_w=recon_w,
        vec_w=vec_w, dense_p=dense_p, compute_dtype=compute_dtype)

    # NCL -> (B, L, C), input channels lane-padded to `channels` (weights padded too).
    x_blc = jnp.transpose(x_ncl, (0, 2, 1)).astype(jnp.float32)
    x_blc = jnp.pad(x_blc, ((0, 0), (0, 0), (0, channels - in_ch)))

    pad_lead = _round_up(pad, 8) if pad > 0 else 0          # 8-aligned interior offset
    seg = _round_up(pad_lead + L + pad, 8)                  # per-batch scratch rows

    kernel = _make_fused_kernel(
        depth=depth, ksize=kernel_size, pad=pad, batch=B, seq_len=L,
        channels=channels, latent=latent, reduced=reduced, recon_w=recon_w,
        pad_lead=pad_lead, seg=seg, softplus_eps=softplus_eps,
        compute_dtype=compute_dtype)

    out_w = r2 + recon_w
    out = pl.pallas_call(
        kernel,
        out_shape=jax.ShapeDtypeStruct((B * L, out_w), jnp.float32),
        grid=(1,),                                           # single step, batch in rows
        in_specs=[
            pl.BlockSpec((B, L, channels), lambda i: (0, 0, 0)),
            pl.BlockSpec(conv_slab.shape, lambda i: (0, 0, 0)),
            pl.BlockSpec(dense_slab.shape, lambda i: (0, 0, 0)),
            pl.BlockSpec(vec_slab.shape, lambda i: (0, 0)),
        ],
        out_specs=pl.BlockSpec((B * L, out_w), lambda i: (0, 0)),
        scratch_shapes=[pltpu.VMEM((B, seg, channels), jnp.float32)],
        compiler_params=pltpu.CompilerParams(
            dimension_semantics=("arbitrary",)),
    )(x_blc, conv_slab, dense_slab, vec_slab)

    out = out.reshape(B, L, out_w)
    mu = out[:, :, :reduced]
    std = out[:, :, reduced:r2]
    recon = jnp.transpose(out[:, :, r2:r2 + in_ch], (0, 2, 1))   # back to NCL
    return recon, mu, std


# ----------------------------------------------------------------------------
# Deterministic parameter construction (PyTorch layouts / shapes)
# ----------------------------------------------------------------------------
def init_beta_vae_params(key, *, in_channels, channels, depth, latent_dim,
                         kernel_size, reduced_size=64):
    assert depth >= 1
    # BetaVAE feeds z = mu (width reduced_size) into decoder.fc = Linear(latent_dim, ...)
    assert latent_dim == reduced_size
    keys = iter(jax.random.split(key, 16 * depth + 32))
    nrm = lambda shape, s=0.1: s * jax.random.normal(next(keys), shape, jnp.float32)

    def bn(c):
        return {"gamma": 1.0 + nrm((c,)), "beta": nrm((c,)),
                "rmean": nrm((c,), 0.05),
                "rvar": 1.0 + 0.1 * jnp.abs(jax.random.normal(next(keys), (c,),
                                                              jnp.float32))}

    p = {"enc_convs": [], "dec_deconvs": []}
    cur = in_channels
    for _ in range(depth):
        p["enc_convs"].append({"w": nrm((channels, cur, kernel_size)),   # Conv1d (Cout,Cin,K)
                               "b": nrm((channels,), 0.05), **bn(channels)})
        cur = channels
    p["enc_final"] = {"w": nrm((latent_dim, channels, 1)), "b": nrm((latent_dim,), 0.05)}
    p["enc_fc"] = {"w": nrm((channels, latent_dim)), "b": nrm((channels,), 0.05)}
    p["fc_mu"] = {"w": nrm((reduced_size, channels)), "b": nrm((reduced_size,), 0.05)}
    p["fc_logvar"] = {"w": nrm((reduced_size, channels)), "b": nrm((reduced_size,), 0.05)}
    p["dec_fc"] = {"w": nrm((channels, latent_dim)), "b": nrm((channels,), 0.05)}
    for _ in range(depth):
        p["dec_deconvs"].append({"w": nrm((channels, channels, kernel_size)),  # ConvT (Cin,Cout,K)
                                 "b": nrm((channels,), 0.05), **bn(channels)})
    p["dec_final"] = {"w": nrm((channels, in_channels, 1)), "b": nrm((in_channels,), 0.05)}
    return p


# ----------------------------------------------------------------------------
if __name__ == "__main__":
    # Small config consistent with the module: x is (batch, in_channels, width).
    B, IN_CH, L = 2, 4, 16
    CHANNELS, DEPTH, LATENT, KSIZE = 32, 2, 64, 5    # latent_dim == reduced_size == 64

    key = jax.random.PRNGKey(0)
    kp, kx = jax.random.split(key)
    params = init_beta_vae_params(
        kp, in_channels=IN_CH, channels=CHANNELS, depth=DEPTH,
        latent_dim=LATENT, kernel_size=KSIZE, reduced_size=64)
    x = jax.random.normal(kx, (B, IN_CH, L), jnp.float32)

    fwd = jax.jit(functools.partial(beta_vae_forward, kernel_size=KSIZE,
                                    softplus_eps=1e-4))
    recon, mu, std = fwd(params, x)
    jax.block_until_ready((recon, mu, std))

    assert recon.shape == (B, IN_CH, L)
    assert mu.shape == (B, L, 64) and std.shape == (B, L, 64)
    assert bool(jnp.all(std > 0))
    assert bool(jnp.all(jnp.isfinite(recon)))
    print("KERNEL_OK")
</pallas_src>

<mosaic_0001>
module attributes {stable_mosaic.version = 11 : i64} {
  func.func @kernel(%arg0: i32, %arg1: memref<2x16x32xf32, #tpu.memory_space<vmem>>, %arg2: memref<4x160x32xbf16, #tpu.memory_space<vmem>>, %arg3: memref<5x128x128xbf16, #tpu.memory_space<vmem>>, %arg4: memref<13x128xf32, #tpu.memory_space<vmem>>, %arg5: memref<32x256xf32, #tpu.memory_space<vmem>>, %arg6: memref<2x32x32xf32, #tpu.memory_space<vmem>>) attributes {dimension_semantics = [#tpu.dimension_semantics<arbitrary>], iteration_bounds = array<i64: 1>, scalar_prefetch = 0 : i64, scratch_operands = 1 : i64, tpu.core_type = #tpu.core_type<tc>, window_params = [{pipeline_mode = #tpu.pipeline_mode<synchronous>, transform_indices = @transform_0, window_bounds = array<i64: 2, 16, 32>}, {pipeline_mode = #tpu.pipeline_mode<synchronous>, transform_indices = @transform_1, window_bounds = array<i64: 4, 160, 32>}, {pipeline_mode = #tpu.pipeline_mode<synchronous>, transform_indices = @transform_2, window_bounds = array<i64: 5, 128, 128>}, {pipeline_mode = #tpu.pipeline_mode<synchronous>, transform_indices = @transform_3, window_bounds = array<i64: 13, 128>}, {pipeline_mode = #tpu.pipeline_mode<synchronous>, transform_indices = @transform_4, window_bounds = array<i64: 32, 256>}]} {
    %cst = arith.constant 0.000000e+00 : f32
    %0 = vector.broadcast %cst : f32 to vector<2x8x32xf32>
    %c0 = arith.constant 0 : index
    %c0_0 = arith.constant 0 : index
    %c0_1 = arith.constant 0 : index
    %1 = vector.load %arg6[%c0, %c0_0, %c0_1] : memref<2x32x32xf32, #tpu.memory_space<vmem>>, vector<2x8x32xf32>
    tpu.vector_store %arg6[%c0, %c0_0, %c0_1], %0 {strides = array<i32>} : memref<2x32x32xf32, #tpu.memory_space<vmem>>, vector<2x8x32xf32>,
    %cst_2 = arith.constant 0.000000e+00 : f32
    %2 = vector.broadcast %cst_2 : f32 to vector<2x8x32xf32>
    %c0_3 = arith.constant 0 : index
    %c24 = arith.constant 24 : index
    %c0_4 = arith.constant 0 : index
    %3 = vector.load %arg6[%c0_3, %c24, %c0_4] : memref<2x32x32xf32, #tpu.memory_space<vmem>>, vector<2x8x32xf32>
    tpu.vector_store %arg6[%c0_3, %c24, %c0_4], %2 {strides = array<i32>} : memref<2x32x32xf32, #tpu.memory_space<vmem>>, vector<2x8x32xf32>,
    %c0_5 = arith.constant 0 : index
    %c0_6 = arith.constant 0 : index
    %c0_7 = arith.constant 0 : index
    %4 = vector.load %arg1[%c0_5, %c0_6, %c0_7] : memref<2x16x32xf32, #tpu.memory_space<vmem>>, vector<2x16x32xf32>
    %5 = vector.shape_cast %4 : vector<2x16x32xf32> to vector<32x32xf32>
    %6 = vector.shape_cast %5 : vector<32x32xf32> to vector<2x16x32xf32>
    %c0_8 = arith.constant 0 : index
    %c8 = arith.constant 8 : index
    %c0_9 = arith.constant 0 : index
    %7 = vector.load %arg6[%c0_8, %c8, %c0_9] : memref<2x32x32xf32, #tpu.memory_space<vmem>>, vector<2x16x32xf32>
    tpu.vector_store %arg6[%c0_8, %c8, %c0_9], %6 {strides = array<i32>} : memref<2x32x32xf32, #tpu.memory_space<vmem>>, vector<2x16x32xf32>,
    %c0_10 = arith.constant 0 : index
    %c6 = arith.constant 6 : index
    %c0_11 = arith.constant 0 : index
    %8 = vector.load %arg6[%c0_10, %c6, %c0_11] : memref<2x32x32xf32, #tpu.memory_space<vmem>>, vector<2x16x32xf32>
    %c0_12 = arith.constant 0 : index
    %c7 = arith.constant 7 : index
    %c0_13 = arith.constant 0 : index
    %9 = vector.load %arg6[%c0_12, %c7, %c0_13] : memref<2x32x32xf32, #tpu.memory_space<vmem>>, vector<2x16x32xf32>
    %c0_14 = arith.constant 0 : index
    %c8_15 = arith.constant 8 : index
    %c0_16 = arith.constant 0 : index
    %10 = vector.load %arg6[%c0_14, %c8_15, %c0_16] : memref<2x32x32xf32, #tpu.memory_space<vmem>>, vector<2x16x32xf32>
    %c0_17 = arith.constant 0 : index
    %c9 = arith.constant 9 : index
    %c0_18 = arith.constant 0 : index
    %11 = vector.load %arg6[%c0_17, %c9, %c0_18] : memref<2x32x32xf32, #tpu.memory_space<vmem>>, vector<2x16x32xf32>
    %c0_19 = arith.constant 0 : index
    %c10 = arith.constant 10 : index
    %c0_20 = arith.constant 0 : index
    %12 = vector.load %arg6[%c0_19, %c10, %c0_20] : memref<2x32x32xf32, #tpu.memory_space<vmem>>, vector<2x16x32xf32>
    %13 = tpu.concatenate %8, %9, %10, %11, %12 in 2 : vector<2x16x32xf32>, vector<2x16x32xf32>, vector<2x16x32xf32>, vector<2x16x32xf32>, vector<2x16x32xf32> -> vector<2x16x160xf32>
    %14 = vector.shape_cast %13 : vector<2x16x160xf32> to vector<32x160xf32>
    %15 = arith.truncf %14 : vector<32x160xf32> to vector<32x160xbf16>
    %c0_21 = arith.constant 0 : index
    %c0_22 = arith.constant 0 : index
    %c0_23 = arith.constant 0 : index
    %16 = vector.load %arg2[%c0_21, %c0_22, %c0_23] : memref<4x160x32xbf16, #tpu.memory_space<vmem>>, vector<1x160x32xbf16>
    %17 = vector.shape_cast %16 : vector<1x160x32xbf16> to vector<160x32xbf16>
    %cst_24 = arith.constant dense<0.000000e+00> : vector<32x32xf32>
    %18 = tpu.matmul %15, %17, %cst_24 {dimension_numbers = #tpu.dot_dimension_numbers<[1], [0], [0], [1], [0, 0, 1, 1], [], []>} : vector<32x160xbf16>, vector<160x32xbf16>, vector<32x32xf32> -> vector<32x32xf32>
    %c0_25 = arith.constant 0 : index
    %c0_26 = arith.constant 0 : index
    %19 = vector.load %arg4[%c0_25, %c0_26] : memref<13x128xf32, #tpu.memory_space<vmem>>, vector<1x32xf32>
    %c1 = arith.constant 1 : index
    %c0_27 = arith.constant 0 : index
    %20 = vector.load %arg4[%c1, %c0_27] : memref<13x128xf32, #tpu.memory_space<vmem>>, vector<1x32xf32>
    %21 = vector.broadcast %19 : vector<1x32xf32> to vector<32x32xf32>
    %22 = arith.mulf %18, %21 : vector<32x32xf32>
    %23 = vector.broadcast %20 : vector<1x32xf32> to vector<32x32xf32>
    %24 = arith.addf %22, %23 : vector<32x32xf32>
    %cst_28 = arith.constant 0.000000e+00 : f32
    %25 = vector.broadcast %cst_28 : f32 to vector<32x32xf32>
    %26 = arith.cmpf ogt, %24, %25 : vector<32x32xf32>
    %cst_29 = arith.constant 2.000000e-01 : f32
    %27 = vector.broadcast %cst_29 : f32 to vector<32x32xf32>
    %28 = arith.mulf %27, %24 : vector<32x32xf32>
    %29 = arith.select %26, %24, %28 : vector<32x32xi1>, vector<32x32xf32>
    %30 = vector.shape_cast %29 : vector<32x32xf32> to vector<2x16x32xf32>
    %c0_30 = arith.constant 0 : index
    %c8_31 = arith.constant 8 : index
    %c0_32 = arith.constant 0 : index
    %31 = vector.load %arg6[%c0_30, %c8_31, %c0_32] : memref<2x32x32xf32, #tpu.memory_space<vmem>>, vector<2x16x32xf32>
    tpu.vector_store %arg6[%c0_30, %c8_31, %c0_32], %30 {strides = array<i32>} : memref<2x32x32xf32, #tpu.memory_space<vmem>>, vector<2x16x32xf32>,
    %c0_33 = arith.constant 0 : index
    %c6_34 = arith.constant 6 : index
    %c0_35 = arith.constant 0 : index
    %32 = vector.load %arg6[%c0_33, %c6_34, %c0_35] : memref<2x32x32xf32, #tpu.memory_space<vmem>>, vector<2x16x32xf32>
    %c0_36 = arith.constant 0 : index
    %c7_37 = arith.constant 7 : index
    %c0_38 = arith.constant 0 : index
    %33 = vector.load %arg6[%c0_36, %c7_37, %c0_38] : memref<2x32x32xf32, #tpu.memory_space<vmem>>, vector<2x16x32xf32>
    %c0_39 = arith.constant 0 : index
    %c8_40 = arith.constant 8 : index
    %c0_41 = arith.constant 0 : index
    %34 = vector.load %arg6[%c0_39, %c8_40, %c0_41] : memref<2x32x32xf32, #tpu.memory_space<vmem>>, vector<2x16x32xf32>
    %c0_42 = arith.constant 0 : index
    %c9_43 = arith.constant 9 : index
    %c0_44 = arith.constant 0 : index
    %35 = vector.load %arg6[%c0_42, %c9_43, %c0_44] : memref<2x32x32xf32, #tpu.memory_space<vmem>>, vector<2x16x32xf32>
    %c0_45 = arith.constant 0 : index
    %c10_46 = arith.constant 10 : index
    %c0_47 = arith.constant 0 : index
    %36 = vector.load %arg6[%c0_45, %c10_46, %c0_47] : memref<2x32x32xf32, #tpu.memory_space<vmem>>, vector<2x16x32xf32>
    %37 = tpu.concatenate %32, %33, %34, %35, %36 in 2 : vector<2x16x32xf32>, vector<2x16x32xf32>, vector<2x16x32xf32>, vector<2x16x32xf32>, vector<2x16x32xf32> -> vector<2x16x160xf32>
    %38 = vector.shape_cast %37 : vector<2x16x160xf32> to vector<32x160xf32>
    %39 = arith.truncf %38 : vector<32x160xf32> to vector<32x160xbf16>
    %c1_48 = arith.constant 1 : index
    %c0_49 = arith.constant 0 : index
    %c0_50 = arith.constant 0 : index
    %40 = vector.load %arg2[%c1_48, %c0_49, %c0_50] : memref<4x160x32xbf16, #tpu.memory_space<vmem>>, vector<1x160x32xbf16>
    %41 = vector.shape_cast %40 : vector<1x160x32xbf16> to vector<160x32xbf16>
    %cst_51 = arith.constant dense<0.000000e+00> : vector<32x32xf32>
    %42 = tpu.matmul %39, %41, %cst_51 {dimension_numbers = #tpu.dot_dimension_numbers<[1], [0], [0], [1], [0, 0, 1, 1], [], []>} : vector<32x160xbf16>, vector<160x32xbf16>, vector<32x32xf32> -> vector<32x32xf32>
    %c2 = arith.constant 2 : index
    %c0_52 = arith.constant 0 : index
    %43 = vector.load %arg4[%c2, %c0_52] : memref<13x128xf32, #tpu.memory_space<vmem>>, vector<1x32xf32>
    %c3 = arith.constant 3 : index
    %c0_53 = arith.constant 0 : index
    %44 = vector.load %arg4[%c3, %c0_53] : memref<13x128xf32, #tpu.memory_space<vmem>>, vector<1x32xf32>
    %45 = vector.broadcast %43 : vector<1x32xf32> to vector<32x32xf32>
    %46 = arith.mulf %42, %45 : vector<32x32xf32>
    %47 = vector.broadcast %44 : vector<1x32xf32> to vector<32x32xf32>
    %48 = arith.addf %46, %47 : vector<32x32xf32>
    %cst_54 = arith.constant 0.000000e+00 : f32
    %49 = vector.broadcast %cst_54 : f32 to vector<32x32xf32>
    %50 = arith.cmpf ogt, %48, %49 : vector<32x32xf32>
    %cst_55 = arith.constant 2.000000e-01 : f32
    %51 = vector.broadcast %cst_55 : f32 to vector<32x32xf32>
    %52 = arith.mulf %51, %48 : vector<32x32xf32>
    %53 = arith.select %50, %48, %52 : vector<32x32xi1>, vector<32x32xf32>
    %c0_56 = arith.constant 0 : index
    %c0_57 = arith.constant 0 : index
    %c0_58 = arith.constant 0 : index
    %54 = vector.load %arg3[%c0_56, %c0_57, %c0_58] : memref<5x128x128xbf16, #tpu.memory_space<vmem>>, vector<1x32x64xbf16>
    %55 = vector.shape_cast %54 : vector<1x32x64xbf16> to vector<32x64xbf16>
    %56 = arith.truncf %53 : vector<32x32xf32> to vector<32x32xbf16>
    %cst_59 = arith.constant dense<0.000000e+00> : vector<32x64xf32>
    %57 = tpu.matmul %56, %55, %cst_59 {dimension_numbers = #tpu.dot_dimension_numbers<[1], [0], [0], [1], [0, 0, 1, 1], [], []>} : vector<32x32xbf16>, vector<32x64xbf16>, vector<32x64xf32> -> vector<32x64xf32>
    %c8_60 = arith.constant 8 : index
    %c0_61 = arith.constant 0 : index
    %58 = vector.load %arg4[%c8_60, %c0_61] : memref<13x128xf32, #tpu.memory_space<vmem>>, vector<1x64xf32>
    %59 = vector.broadcast %58 : vector<1x64xf32> to vector<32x64xf32>
    %60 = arith.addf %57, %59 : vector<32x64xf32>
    %c1_62 = arith.constant 1 : index
    %c0_63 = arith.constant 0 : index
    %c0_64 = arith.constant 0 : index
    %61 = vector.load %arg3[%c1_62, %c0_63, %c0_64] : memref<5x128x128xbf16, #tpu.memory_space<vmem>>, vector<1x64x32xbf16>
    %62 = vector.shape_cast %61 : vector<1x64x32xbf16> to vector<64x32xbf16>
    %63 = arith.truncf %60 : vector<32x64xf32> to vector<32x64xbf16>
    %cst_65 = arith.constant dense<0.000000e+00> : vector<32x32xf32>
    %64 = tpu.matmul %63, %62, %cst_65 {dimension_numbers = #tpu.dot_dimension_numbers<[1], [0], [0], [1], [0, 0, 1, 1], [], []>} : vector<32x64xbf16>, vector<64x32xbf16>, vector<32x32xf32> -> vector<32x32xf32>
    %c9_66 = arith.constant 9 : index
    %c0_67 = arith.constant 0 : index
    %65 = vector.load %arg4[%c9_66, %c0_67] : memref<13x128xf32, #tpu.memory_space<vmem>>, vector<1x32xf32>
    %66 = vector.broadcast %65 : vector<1x32xf32> to vector<32x32xf32>
    %67 = arith.addf %64, %66 : vector<32x32xf32>
    %cst_68 = arith.constant 0.000000e+00 : f32
    %68 = vector.broadcast %cst_68 : f32 to vector<32x32xf32>
    %69 = arith.cmpf ogt, %67, %68 : vector<32x32xf32>
    %cst_69 = arith.constant 2.000000e-01 : f32
    %70 = vector.broadcast %cst_69 : f32 to vector<32x32xf32>
    %71 = arith.mulf %70, %67 : vector<32x32xf32>
    %72 = arith.select %69, %67, %71 : vector<32x32xi1>, vector<32x32xf32>
    %c2_70 = arith.constant 2 : index
    %c0_71 = arith.constant 0 : index
    %c0_72 = arith.constant 0 : index
    %73 = vector.load %arg3[%c2_70, %c0_71, %c0_72] : memref<5x128x128xbf16, #tpu.memory_space<vmem>>, vector<1x32x128xbf16>
    %74 = vector.shape_cast %73 : vector<1x32x128xbf16> to vector<32x128xbf16>
    %75 = arith.truncf %72 : vector<32x32xf32> to vector<32x32xbf16>
    %cst_73 = arith.constant dense<0.000000e+00> : vector<32x128xf32>
    %76 = tpu.matmul %75, %74, %cst_73 {dimension_numbers = #tpu.dot_dimension_numbers<[1], [0], [0], [1], [0, 0, 1, 1], [], []>} : vector<32x32xbf16>, vector<32x128xbf16>, vector<32x128xf32> -> vector<32x128xf32>
    %c10_74 = arith.constant 10 : index
    %c0_75 = arith.constant 0 : index
    %77 = vector.load %arg4[%c10_74, %c0_75] : memref<13x128xf32, #tpu.memory_space<vmem>>, vector<1x128xf32>
    %78 = vector.broadcast %77 : vector<1x128xf32> to vector<32x128xf32>
    %79 = arith.addf %76, %78 : vector<32x128xf32>
    %80 = tpu.iota {dimensions = array<i32: 1>} : vector<32x128xi32>
    %c64_i32 = arith.constant 64 : i32
    %81 = vector.broadcast %c64_i32 : i32 to vector<32x128xi32>
    %82 = arith.cmpi slt, %80, %81 : vector<32x128xi32>
    %cst_76 = arith.constant 0.000000e+00 : f32
    %83 = vector.broadcast %cst_76 : f32 to vector<32x128xf32>
    %84 = arith.maximumf %79, %83 : vector<32x128xf32>
    %85 = vector.broadcast %cst_76 : f32 to vector<32x128xf32>
    %86 = arith.subf %79, %85 : vector<32x128xf32>
    %87 = arith.cmpf one, %86, %86 : vector<32x128xf32>
    %88 = vector.broadcast %cst_76 : f32 to vector<32x128xf32>
    %89 = arith.addf %79, %88 : vector<32x128xf32>
    %90 = math.absf %86 : vector<32x128xf32>
    %cst_77 = arith.constant 0.000000e+00 : f32
    %91 = vector.broadcast %cst_77 : f32 to vector<32x128xf32>
    %92 = arith.subf %91, %90 : vector<32x128xf32>
    %93 = math.exp %92 : vector<32x128xf32>
    %94 = math.log1p %93 : vector<32x128xf32>
    %95 = arith.addf %84, %94 : vector<32x128xf32>
    %96 = arith.select %87, %89, %95 : vector<32x128xi1>, vector<32x128xf32>
    %cst_78 = arith.constant 9.99999974E-5 : f32
    %97 = vector.broadcast %cst_78 : f32 to vector<32x128xf32>
    %98 = arith.addf %96, %97 : vector<32x128xf32>
    %99 = arith.select %82, %79, %98 : vector<32x128xi1>, vector<32x128xf32>
    %c3_79 = arith.constant 3 : index
    %c0_80 = arith.constant 0 : index
    %c0_81 = arith.constant 0 : index
    %100 = vector.load %arg3[%c3_79, %c0_80, %c0_81] : memref<5x128x128xbf16, #tpu.memory_space<vmem>>, vector<1x128x32xbf16>
    %101 = vector.shape_cast %100 : vector<1x128x32xbf16> to vector<128x32xbf16>
    %102 = arith.truncf %79 : vector<32x128xf32> to vector<32x128xbf16>
    %cst_82 = arith.constant dense<0.000000e+00> : vector<32x32xf32>
    %103 = tpu.matmul %102, %101, %cst_82 {dimension_numbers = #tpu.dot_dimension_numbers<[1], [0], [0], [1], [0, 0, 1, 1], [], []>} : vector<32x128xbf16>, vector<128x32xbf16>, vector<32x32xf32> -> vector<32x32xf32>
    %c11 = arith.constant 11 : index
    %c0_83 = arith.constant 0 : index
    %104 = vector.load %arg4[%c11, %c0_83] : memref<13x128xf32, #tpu.memory_space<vmem>>, vector<1x32xf32>
    %105 = vector.broadcast %104 : vector<1x32xf32> to vector<32x32xf32>
    %106 = arith.addf %103, %105 : vector<32x32xf32>
    %cst_84 = arith.constant 0.000000e+00 : f32
    %107 = vector.broadcast %cst_84 : f32 to vector<32x32xf32>
    %108 = arith.cmpf ogt, %106, %107 : vector<32x32xf32>
    %cst_85 = arith.constant 2.000000e-01 : f32
    %109 = vector.broadcast %cst_85 : f32 to vector<32x32xf32>
    %110 = arith.mulf %109, %106 : vector<32x32xf32>
    %111 = arith.select %108, %106, %110 : vector<32x32xi1>, vector<32x32xf32>
    %112 = vector.shape_cast %111 : vector<32x32xf32> to vector<2x16x32xf32>
    %c0_86 = arith.constant 0 : index
    %c8_87 = arith.constant 8 : index
    %c0_88 = arith.constant 0 : index
    %113 = vector.load %arg6[%c0_86, %c8_87, %c0_88] : memref<2x32x32xf32, #tpu.memory_space<vmem>>, vector<2x16x32xf32>
    tpu.vector_store %arg6[%c0_86, %c8_87, %c0_88], %112 {strides = array<i32>} : memref<2x32x32xf32, #tpu.memory_space<vmem>>, vector<2x16x32xf32>,
    %c0_89 = arith.constant 0 : index
    %c6_90 = arith.constant 6 : index
    %c0_91 = arith.constant 0 : index
    %114 = vector.load %arg6[%c0_89, %c6_90, %c0_91] : memref<2x32x32xf32, #tpu.memory_space<vmem>>, vector<2x16x32xf32>
    %c0_92 = arith.constant 0 : index
    %c7_93 = arith.constant 7 : index
    %c0_94 = arith.constant 0 : index
    %115 = vector.load %arg6[%c0_92, %c7_93, %c0_94] : memref<2x32x32xf32, #tpu.memory_space<vmem>>, vector<2x16x32xf32>
    %c0_95 = arith.constant 0 : index
    %c8_96 = arith.constant 8 : index
    %c0_97 = arith.constant 0 : index
    %116 = vector.load %arg6[%c0_95, %c8_96, %c0_97] : memref<2x32x32xf32, #tpu.memory_space<vmem>>, vector<2x16x32xf32>
    %c0_98 = arith.constant 0 : index
    %c9_99 = arith.constant 9 : index
    %c0_100 = arith.constant 0 : index
    %117 = vector.load %arg6[%c0_98, %c9_99, %c0_100] : memref<2x32x32xf32, #tpu.memory_space<vmem>>, vector<2x16x32xf32>
    %c0_101 = arith.constant 0 : index
    %c10_102 = arith.constant 10 : index
    %c0_103 = arith.constant 0 : index
    %118 = vector.load %arg6[%c0_101, %c10_102, %c0_103] : memref<2x32x32xf32, #tpu.memory_space<vmem>>, vector<2x16x32xf32>
    %119 = tpu.concatenate %114, %115, %116, %117, %118 in 2 : vector<2x16x32xf32>, vector<2x16x32xf32>, vector<2x16x32xf32>, vector<2x16x32xf32>, vector<2x16x32xf32> -> vector<2x16x160xf32>
    %120 = vector.shape_cast %119 : vector<2x16x160xf32> to vector<32x160xf32>
    %121 = arith.truncf %120 : vector<32x160xf32> to vector<32x160xbf16>
    %c2_104 = arith.constant 2 : index
    %c0_105 = arith.constant 0 : index
    %c0_106 = arith.constant 0 : index
    %122 = vector.load %arg2[%c2_104, %c0_105, %c0_106] : memref<4x160x32xbf16, #tpu.memory_space<vmem>>, vector<1x160x32xbf16>
    %123 = vector.shape_cast %122 : vector<1x160x32xbf16> to vector<160x32xbf16>
    %cst_107 = arith.constant dense<0.000000e+00> : vector<32x32xf32>
    %124 = tpu.matmul %121, %123, %cst_107 {dimension_numbers = #tpu.dot_dimension_numbers<[1], [0], [0], [1], [0, 0, 1, 1], [], []>} : vector<32x160xbf16>, vector<160x32xbf16>, vector<32x32xf32> -> vector<32x32xf32>
    %c4 = arith.constant 4 : index
    %c0_108 = arith.constant 0 : index
    %125 = vector.load %arg4[%c4, %c0_108] : memref<13x128xf32, #tpu.memory_space<vmem>>, vector<1x32xf32>
    %c5 = arith.constant 5 : index
    %c0_109 = arith.constant 0 : index
    %126 = vector.load %arg4[%c5, %c0_109] : memref<13x128xf32, #tpu.memory_space<vmem>>, vector<1x32xf32>
    %127 = vector.broadcast %125 : vector<1x32xf32> to vector<32x32xf32>
    %128 = arith.mulf %124, %127 : vector<32x32xf32>
    %129 = vector.broadcast %126 : vector<1x32xf32> to vector<32x32xf32>
    %130 = arith.addf %128, %129 : vector<32x32xf32>
    %cst_110 = arith.constant 0.000000e+00 : f32
    %131 = vector.broadcast %cst_110 : f32 to vector<32x32xf32>
    %132 = arith.cmpf ogt, %130, %131 : vector<32x32xf32>
    %cst_111 = arith.constant 2.000000e-01 : f32
    %133 = vector.broadcast %cst_111 : f32 to vector<32x32xf32>
    %134 = arith.mulf %133, %130 : vector<32x32xf32>
    %135 = arith.select %132, %130, %134 : vector<32x32xi1>, vector<32x32xf32>
    %136 = vector.shape_cast %135 : vector<32x32xf32> to vector<2x16x32xf32>
    %c0_112 = arith.constant 0 : index
    %c8_113 = arith.constant 8 : index
    %c0_114 = arith.constant 0 : index
    %137 = vector.load %arg6[%c0_112, %c8_113, %c0_114] : memref<2x32x32xf32, #tpu.memory_space<vmem>>, vector<2x16x32xf32>
    tpu.vector_store %arg6[%c0_112, %c8_113, %c0_114], %136 {strides = array<i32>} : memref<2x32x32xf32, #tpu.memory_space<vmem>>, vector<2x16x32xf32>,
    %c0_115 = arith.constant 0 : index
    %c6_116 = arith.constant 6 : index
    %c0_117 = arith.constant 0 : index
    %138 = vector.load %arg6[%c0_115, %c6_116, %c0_117] : memref<2x32x32xf32, #tpu.memory_space<vmem>>, vector<2x16x32xf32>
    %c0_118 = arith.constant 0 : index
    %c7_119 = arith.constant 7 : index
    %c0_120 = arith.constant 0 : index
    %139 = vector.load %arg6[%c0_118, %c7_119, %c0_120] : memref<2x32x32xf32, #tpu.memory_space<vmem>>, vector<2x16x32xf32>
    %c0_121 = arith.constant 0 : index
    %c8_122 = arith.constant 8 : index
    %c0_123 = arith.constant 0 : index
    %140 = vector.load %arg6[%c0_121, %c8_122, %c0_123] : memref<2x32x32xf32, #tpu.memory_space<vmem>>, vector<2x16x32xf32>
    %c0_124 = arith.constant 0 : index
    %c9_125 = arith.constant 9 : index
    %c0_126 = arith.constant 0 : index
    %141 = vector.load %arg6[%c0_124, %c9_125, %c0_126] : memref<2x32x32xf32, #tpu.memory_space<vmem>>, vector<2x16x32xf32>
    %c0_127 = arith.constant 0 : index
    %c10_128 = arith.constant 10 : index
    %c0_129 = arith.constant 0 : index
    %142 = vector.load %arg6[%c0_127, %c10_128, %c0_129] : memref<2x32x32xf32, #tpu.memory_space<vmem>>, vector<2x16x32xf32>
    %143 = tpu.concatenate %138, %139, %140, %141, %142 in 2 : vector<2x16x32xf32>, vector<2x16x32xf32>, vector<2x16x32xf32>, vector<2x16x32xf32>, vector<2x16x32xf32> -> vector<2x16x160xf32>
    %144 = vector.shape_cast %143 : vector<2x16x160xf32> to vector<32x160xf32>
    %145 = arith.truncf %144 : vector<32x160xf32> to vector<32x160xbf16>
    %c3_130 = arith.constant 3 : index
    %c0_131 = arith.constant 0 : index
    %c0_132 = arith.constant 0 : index
    %146 = vector.load %arg2[%c3_130, %c0_131, %c0_132] : memref<4x160x32xbf16, #tpu.memory_space<vmem>>, vector<1x160x32xbf16>
    %147 = vector.shape_cast %146 : vector<1x160x32xbf16> to vector<160x32xbf16>
    %cst_133 = arith.constant dense<0.000000e+00> : vector<32x32xf32>
    %148 = tpu.matmul %145, %147, %cst_133 {dimension_numbers = #tpu.dot_dimension_numbers<[1], [0], [0], [1], [0, 0, 1, 1], [], []>} : vector<32x160xbf16>, vector<160x32xbf16>, vector<32x32xf32> -> vector<32x32xf32>
    %c6_134 = arith.constant 6 : index
    %c0_135 = arith.constant 0 : index
    %149 = vector.load %arg4[%c6_134, %c0_135] : memref<13x128xf32, #tpu.memory_space<vmem>>, vector<1x32xf32>
    %c7_136 = arith.constant 7 : index
    %c0_137 = arith.constant 0 : index
    %150 = vector.load %arg4[%c7_136, %c0_137] : memref<13x128xf32, #tpu.memory_space<vmem>>, vector<1x32xf32>
    %151 = vector.broadcast %149 : vector<1x32xf32> to vector<32x32xf32>
    %152 = arith.mulf %148, %151 : vector<32x32xf32>
    %153 = vector.broadcast %150 : vector<1x32xf32> to vector<32x32xf32>
    %154 = arith.addf %152, %153 : vector<32x32xf32>
    %cst_138 = arith.constant 0.000000e+00 : f32
    %155 = vector.broadcast %cst_138 : f32 to vector<32x32xf32>
    %156 = arith.cmpf ogt, %154, %155 : vector<32x32xf32>
    %cst_139 = arith.constant 2.000000e-01 : f32
    %157 = vector.broadcast %cst_139 : f32 to vector<32x32xf32>
    %158 = arith.mulf %157, %154 : vector<32x32xf32>
    %159 = arith.select %156, %154, %158 : vector<32x32xi1>, vector<32x32xf32>
    %c4_140 = arith.constant 4 : index
    %c0_141 = arith.constant 0 : index
    %c0_142 = arith.constant 0 : index
    %160 = vector.load %arg3[%c4_140, %c0_141, %c0_142] : memref<5x128x128xbf16, #tpu.memory_space<vmem>>, vector<1x32x128xbf16>
    %161 = vector.shape_cast %160 : vector<1x32x128xbf16> to vector<32x128xbf16>
    %162 = arith.truncf %159 : vector<32x32xf32> to vector<32x32xbf16>
    %cst_143 = arith.constant dense<0.000000e+00> : vector<32x128xf32>
    %163 = tpu.matmul %162, %161, %cst_143 {dimension_numbers = #tpu.dot_dimension_numbers<[1], [0], [0], [1], [0, 0, 1, 1], [], []>} : vector<32x32xbf16>, vector<32x128xbf16>, vector<32x128xf32> -> vector<32x128xf32>
    %c12 = arith.constant 12 : index
    %c0_144 = arith.constant 0 : index
    %164 = vector.load %arg4[%c12, %c0_144] : memref<13x128xf32, #tpu.memory_space<vmem>>, vector<1x128xf32>
    %165 = vector.broadcast %164 : vector<1x128xf32> to vector<32x128xf32>
    %166 = arith.addf %163, %165 : vector<32x128xf32>
    %167 = tpu.concatenate %99, %166 in 1 : vector<32x128xf32>, vector<32x128xf32> -> vector<32x256xf32>
    %c0_145 = arith.constant 0 : index
    %c0_146 = arith.constant 0 : index
    %168 = vector.load %arg5[%c0_145, %c0_146] : memref<32x256xf32, #tpu.memory_space<vmem>>, vector<32x256xf32>
    tpu.vector_store %arg5[%c0_145, %c0_146], %167 {strides = array<i32>} : memref<32x256xf32, #tpu.memory_space<vmem>>, vector<32x256xf32>,
    return
  }
  func.func @transform_0(%arg0: i32) -> (i32, i32, i32) {
    %c0_i32 = arith.constant 0 : i32
    %c0_i32_0 = arith.constant 0 : i32
    %c0_i32_1 = arith.constant 0 : i32
    %c0_i32_2 = arith.constant 0 : i32
    return %c0_i32, %c0_i32_0, %c0_i32_1 : i32, i32, i32
  }
  func.func @transform_1(%arg0: i32) -> (i32, i32, i32) {
    %c0_i32 = arith.constant 0 : i32
    %c0_i32_0 = arith.constant 0 : i32
    %c0_i32_1 = arith.constant 0 : i32
    %c0_i32_2 = arith.constant 0 : i32
    return %c0_i32, %c0_i32_0, %c0_i32_1 : i32, i32, i32
  }
  func.func @transform_2(%arg0: i32) -> (i32, i32, i32) {
    %c0_i32 = arith.constant 0 : i32
    %c0_i32_0 = arith.constant 0 : i32
    %c0_i32_1 = arith.constant 0 : i32
    %c0_i32_2 = arith.constant 0 : i32
    return %c0_i32, %c0_i32_0, %c0_i32_1 : i32, i32, i32
  }
  func.func @transform_3(%arg0: i32) -> (i32, i32) {
    %c0_i32 = arith.constant 0 : i32
    %c0_i32_0 = arith.constant 0 : i32
    %c0_i32_1 = arith.constant 0 : i32
    return %c0_i32, %c0_i32_0 : i32, i32
  }
  func.func @transform_4(%arg0: i32) -> (i32, i32) {
    %c0_i32 = arith.constant 0 : i32
    %c0_i32_0 = arith.constant 0 : i32
    %c0_i32_1 = arith.constant 0 : i32
    return %c0_i32, %c0_i32_0 : i32, i32
  }
}

</mosaic_0001>

<bundles_post_ra>
// kernel: beta_vae_forward.1
= control target key start
LH: loop header
LB: loop body
LE: loop exit
PB: predicated region body
PF: predicated region fallthrough
CT: control target
= control target key end

     0   :  { %vm18_vm0 = vcmask 261120   ;;  %v2077_v0 = vmov 0.0   ;;  %v2078_v4 = vmov 0   ;;  %s2080_s5 = smov 96   ;;  %s2081_s6 = smov 64   ;;  %vm103_vm1 = vcmask 523264   ;;  %s2544_s0 = inlined_call_operand.vmem [shape: f32[2,16,32], index: 0, kind: input, shape index: {}]   ;;  %s2545_s1 = inlined_call_operand.vmem [shape: bf16[4,160,32], index: 1, kind: input, shape index: {}]   ;;  %s2546_s3 = inlined_call_operand.vmem [shape: f32[13,128], index: 3, kind: input, shape index: {}]   ;;  %s2547_s2 = inlined_call_operand.vmem [shape: bf16[5,128,128], index: 2, kind: input, shape index: {}]   ;;  %s2548_s4 = inlined_call_operand.vmem [shape: f32[32,256], index: 4, kind: output, shape index: {}]  }
   0x1   :  { %19 = vst.msk [vmem:[#allocation2] sm:$0xff] %vm18_vm0, %v2077_v0  ;;  %v23_v1 = vld [vmem:[%s2544_s0] sm:$0xff]  ;;  %v24_v2 = vld [vmem:[%s2544_s0 + $0x8] sm:$0xff]  ;;  %v26_v3 = vld [vmem:[%s2544_s0 + $0x18] sm:$0xff]  ;;  %203 = vmatprep.subr.bf16.mxu0 %v2078_v4  ;;  %457 = vmatprep.subr.bf16.mxu1 %v2078_v4  ;;  %vm108_vm2 = vcmask 785408  }
   0x2   :  { %20 = vst.msk [vmem:[#allocation2 + $0x20] sm:$0xff] %vm18_vm0, %v2077_v0  ;;  %21 = vst.msk [vmem:[#allocation2 + $0x18] sm:$0xff] %vm18_vm0, %v2077_v0  ;;  %v25_v5 = vld [vmem:[%s2544_s0 + $0x10] sm:$0xff]  ;;  %v2003_v6 = vld [vmem:[%s2545_s1 + $0x38] sm:$0xff]   ;;  %s2079_s0 = smov 32  }
   0x3   :  { %22 = vst.msk [vmem:[#allocation2 + $0x38] sm:$0xff] %vm18_vm0, %v2077_v0  ;;  %27 = vst.msk [vmem:[#allocation2 + $0x8] sm:$0xff] %vm18_vm0, %v23_v1  ;;  %204 = vmatpush1.bf16.msra.mxu0 %v2003_v6  ;;  %v2004_v7 = vld [vmem:[%s2545_s1 + $0x30] sm:$0xff]   ;;  %v2005_v8 = vld [vmem:[%s2545_s1 + $0x28] sm:$0xff]  }
   0x4   :  { %28 = vst.msk [vmem:[#allocation2 + $0x10] sm:$0xff] %vm18_vm0, %v24_v2  ;;  %30 = vst.msk [vmem:[#allocation2 + $0x30] sm:$0xff] %vm18_vm0, %v26_v3  ;;  %205 = vmatprep.subr.bf16.mxu0 %v2078_v4  ;;  %v2006_v21 = vld [vmem:[%s2545_s1 + $0x20] sm:$0xff]   ;;  %v2007_v28 = vld [vmem:[%s2545_s1 + $0x18] sm:$0xff]  }
   0x5   :  { %29 = vst.msk [vmem:[#allocation2 + $0x28] sm:$0xff] %vm18_vm0, %v25_v5  ;;  %v2008_v31 = vld [vmem:[%s2545_s1 + $0x10] sm:$0xff]   ;;  %v2009_v33 = vld [vmem:[%s2545_s1 + $0x8] sm:$0xff]   ;;  %v2010_v34 = vld [vmem:[%s2545_s1] sm:$0xff]  }
   0x6   :  { %v2011_v35 = vld [vmem:[%s2545_s1 + $0x48] sm:$0xff]   ;;  %v2012_v36 = vld [vmem:[%s2545_s1 + $0x40] sm:$0xff]  }
   0x7   :  { %206 = vmatpush1.bf16.msra.mxu0 %v2004_v7 }
   0x8   :  { %207 = vmatprep.subr.bf16.mxu0 %v2078_v4 }
   0xa   :  { %v35_v9 = vld [vmem:[#allocation2 + $0x7] sm:$0xff] }
   0xb   :  { %v36_v10 = vld [vmem:[#allocation2 + $0xf] sm:$0xff]  ;;  %208 = vmatpush1.bf16.msra.mxu0 %v2005_v8  ;;  %v31_v41 = vld [vmem:[#allocation2 + $0x6] sm:$0xff] }
   0xc   :  { %v43_v11 = vld [vmem:[#allocation2 + $0x9] sm:$0xff]  ;;  %v1883_v12 = vpack.i.bf16 %v36_v10, %v35_v9  ;;  %v44_v13 = vld [vmem:[#allocation2 + $0x11] sm:$0xff]  ;;  %209 = vmatprep.subr.bf16.mxu0 %v2078_v4 }
   0xd   :  { %v39_v14 = vld [vmem:[#allocation2 + $0x8] sm:$0xff]  ;;  %v40_v15 = vld [vmem:[#allocation2 + $0x10] sm:$0xff]  ;;  %v1893_v16 = vpack.i.bf16 %v44_v13, %v43_v11 }
   0xe   :  { %v37_v17 = vld [vmem:[#allocation2 + $0x27] sm:$0xff]  ;;  %v38_v18 = vld [vmem:[#allocation2 + $0x2f] sm:$0xff]  ;;  %1884 = vrot.lane.b32.xlu0 %v1883_v12, %s2079_s0  ;;  %v1888_v19 = vpack.i.bf16 %v40_v15, %v39_v14  ;;  %v2015_v15 = vld [vmem:[%s2545_s1 + $0x78] sm:$0xff]  }
   0xf   :  { %v41_v20 = vld [vmem:[#allocation2 + $0x28] sm:$0xff]  ;;  %1894 = vrot.lane.b32.xlu1 %v1893_v16, %s2080_s5  ;;  %v1898_v22 = vpack.i.bf16 %v38_v18, %v37_v17  ;;  %v42_v23 = vld [vmem:[#allocation2 + $0x30] sm:$0xff]  ;;  %210 = vmatpush1.bf16.msra.mxu0 %v2006_v21  ;;  %v2014_v14 = vld [vmem:[%s2545_s1 + $0x80] sm:$0xff]  }
  0x10   :  { %v45_v24 = vld [vmem:[#allocation2 + $0x29] sm:$0xff]  ;;  %v46_v25 = vld [vmem:[#allocation2 + $0x31] sm:$0xff]  ;;  %v1903_v26 = vpack.i.bf16 %v42_v23, %v41_v20  ;;  %211 = vmatprep.subr.bf16.mxu0 %v2078_v4  ;;  %v2018_v18 = vld [vmem:[%s2545_s1 + $0x60] sm:$0xff]  }
  0x11   :  { %v1908_v27 = vpack.i.bf16 %v46_v25, %v45_v24  ;;  %v47_v29 = vld [vmem:[#allocation2 + $0xa] sm:$0xff]  ;;  %v48_v30 = vld [vmem:[#allocation2 + $0x12] sm:$0xff]  ;;  %v1627_v21 = vld [vmem:[%s2546_s3] ss:$0 sm:$0xff] }
  0x12   :  { %1889 = vrot.lane.b32.xlu0 %v1888_v19, %s2081_s6  ;;  %v114_v32 = vpack.c.bf16 %v48_v30, %v47_v29  ;;  %v32_v42 = vld [vmem:[#allocation2 + $0xe] sm:$0xff]  ;;  %v33_v50 = vld [vmem:[#allocation2 + $0x26] sm:$0xff]  ;;  %v2019_v19 = vld [vmem:[%s2545_s1 + $0x58] sm:$0xff]  }
  0x13   :  { %1899 = vrot.lane.b32.xlu1 %v1898_v22, %s2079_s0  ;;  %212 = vmatpush1.bf16.msra.mxu0 %v2007_v28  ;;  %v49_v46 = vld [vmem:[#allocation2 + $0x2a] sm:$0xff]  ;;  %v50_v47 = vld [vmem:[#allocation2 + $0x32] sm:$0xff]  ;;  %v1628_v23 = vld [vmem:[%s2546_s3 + $0x1] ss:$0 sm:$0xff] }
  0x14   :  { %213 = vmatprep.subr.bf16.mxu0 %v2078_v4  ;;  %1625 = vmatprep.mubr.msk.bf16.mxu0 %vm18_vm0, %v114_v32  ;;  %v34_v51 = vld [vmem:[#allocation2 + $0x2e] sm:$0xff]  ;;  %v116_v59 = vpack.c.bf16 %v50_v47, %v49_v46 }
  0x15   :  { %v2013_v13 = vld [vmem:[%s2545_s1 + $0x88] sm:$0xff]   ;;  %v2016_v16 = vld [vmem:[%s2545_s1 + $0x70] sm:$0xff]  }
  0x16   :  { %1904 = vrot.lane.b32.xlu0 %v1903_v26, %s2081_s6  ;;  %458 = vmatpush1.bf16.msra.mxu1 %v2013_v13  ;;  %v2017_v17 = vld [vmem:[%s2545_s1 + $0x68] sm:$0xff]   ;;  %v2020_v20 = vld [vmem:[%s2545_s1 + $0x50] sm:$0xff]  }
  0x17   :  { %1909 = vrot.lane.b32.xlu1 %v1908_v27, %s2080_s5  ;;  %214 = vmatpush1.bf16.msra.mxu0 %v2008_v31 }
  0x18   :  { %215 = vmatprep.subr.bf16.mxu0 %v2078_v4  ;;  %459 = vmatprep.subr.bf16.mxu1 %v2078_v4 }
  0x1a   :  { %460 = vmatpush1.bf16.msra.mxu1 %v2014_v14 }
  0x1b   :  { %216 = vmatpush1.bf16.msra.mxu0 %v2009_v33  ;;  %461 = vmatprep.subr.bf16.mxu1 %v2078_v4 }
  0x1c   :  { %217 = vmatprep.subr.bf16.mxu0 %v2078_v4 }
  0x1e   :  { %462 = vmatpush1.bf16.msra.mxu1 %v2015_v15 }
  0x1f   :  { %218 = vmatpush1.bf16.msra.mxu0 %v2010_v34  ;;  %463 = vmatprep.subr.bf16.mxu1 %v2078_v4 }
  0x20   :  { %231 = vmatprep.subr.bf16.mxu0 %v2078_v4 }
  0x22   :  { %464 = vmatpush1.bf16.msra.mxu1 %v2016_v16 }
  0x23   :  { %232 = vmatpush2.bf16.msra.mxu0 %v2011_v35  ;;  %465 = vmatprep.subr.bf16.mxu1 %v2078_v4 }
  0x24   :  { %233 = vmatprep.subr.bf16.mxu0 %v2078_v4 }
  0x26   :  { %466 = vmatpush1.bf16.msra.mxu1 %v2017_v17 }
  0x27   :  { %234 = vmatpush2.bf16.msra.mxu0 %v2012_v36  ;;  %467 = vmatprep.subr.bf16.mxu1 %v2078_v4 }
  0x2a   :  { %468 = vmatpush1.bf16.msra.mxu1 %v2018_v18 }
  0x2b   :  { %469 = vmatprep.subr.bf16.mxu1 %v2078_v4 }
  0x2e   :  { %470 = vmatpush1.bf16.msra.mxu1 %v2019_v19 }
  0x2f   :  { %471 = vmatprep.subr.bf16.mxu1 %v2078_v4 }
  0x32   :  { %472 = vmatpush1.bf16.msra.mxu1 %v2020_v20 }
  0x33   :  { %485 = vmatprep.subr.bf16.mxu1 %v2078_v4 }
  0x80   :  { %v1885_v37 = vpop.permute.xlu0 %1884 }
  0x81   :  { %v1895_v38 = vpop.permute.xlu1 %1894  ;;  %v1887_v39 = vunpack.i.h.bf16 %v1885_v37  ;;  %v1886_v40 = vunpack.i.l.bf16 %v1885_v37 }
  0x82   :  { %v1897_v43 = vunpack.i.h.bf16 %v1895_v38  ;;  %v1896_v44 = vunpack.i.l.bf16 %v1895_v38 }
  0x83   :  { %v99_v53 = vsel %vm18_vm0, %v31_v41, %v1886_v40  ;;  %v100_v54 = vsel %vm18_vm0, %v32_v42, %v1887_v39  ;;  %v2021_v39 = vld [vmem:[%s2545_s1 + $0x98] sm:$0xff]  }
  0x84   :  { %v1890_v45 = vpop.permute.xlu0 %1889  ;;  %486 = vmatpush2.bf16.msra.mxu1 %v2021_v39 }
  0x85   :  { %v1892_v48 = vunpack.i.h.bf16 %v1890_v45  ;;  %v1891_v49 = vunpack.i.l.bf16 %v1890_v45  ;;  %v1900_v52 = vpop.permute.xlu1 %1899  ;;  %487 = vmatprep.subr.bf16.mxu1 %v2078_v4 }
  0x86   :  { %v1902_v55 = vunpack.i.h.bf16 %v1900_v52  ;;  %v1901_v56 = vunpack.i.l.bf16 %v1900_v52 }
  0x87   :  { %v104_v57 = vsel %vm103_vm1, %v99_v53, %v1891_v49  ;;  %v105_v58 = vsel %vm103_vm1, %v100_v54, %v1892_v48 }
  0x88   :  { %v102_v60 = vsel %vm18_vm0, %v34_v51, %v1902_v55  ;;  %v101_v61 = vsel %vm18_vm0, %v33_v50, %v1901_v56  ;;  %v1905_v62 = vpop.permute.xlu0 %1904  ;;  %v109_v63 = vsel %vm108_vm2, %v104_v57, %v1896_v44  ;;  %v110_v0 = vsel %vm108_vm2, %v105_v58, %v1897_v43  ;;  %v2022_v44 = vld [vmem:[%s2545_s1 + $0x90] sm:$0xff]  }
  0x89   :  { %v1907_v1 = vunpack.i.h.bf16 %v1905_v62  ;;  %v1906_v2 = vunpack.i.l.bf16 %v1905_v62  ;;  %v1910_v3 = vpop.permute.xlu1 %1909  ;;  %v113_v5 = vpack.c.bf16 %v110_v0, %v109_v63  ;;  %488 = vmatpush2.bf16.msra.mxu1 %v2022_v44 }
  0x8a   :  { %v1912_v6 = vunpack.i.h.bf16 %v1910_v3  ;;  %v1911_v7 = vunpack.i.l.bf16 %v1910_v3 }
  0x8b   :  { %v107_v8 = vsel %vm103_vm1, %v102_v60, %v1907_v1  ;;  %v106_v9 = vsel %vm103_vm1, %v101_v61, %v1906_v2  ;;  %236 = vmatmul.mubr.bf16.vlgmr.msra.gmra.mxu0 %v113_v5 }
  0x8c   :  { %1626 = vmatprep.mubr.msk.bf16.mxu0 %vm18_vm0, %v116_v59  ;;  %v111_v10 = vsel %vm108_vm2, %v106_v9, %v1911_v7  ;;  %v112_v11 = vsel %vm108_vm2, %v107_v8, %v1912_v6 }
  0x8d   :  { %v115_v12 = vpack.c.bf16 %v112_v11, %v111_v10 }
  0x93   :  { %244 = vmatmul.mubr.bf16.gmra.mxu0 %v115_v12 }
 0x14b   :  { %v237_v22 = vpop.f32.mrf.mxu0 }
 0x14c   :  { %v258_v24 = vmul.f32 %v1627_v21, %v237_v22 }
 0x14d   :  { %v239_v25 = vpop.f32.mrf.mxu0 }
 0x14e   :  { %v266_v26 = vadd.f32 %v1628_v23, %v258_v24 }
 0x14f   :  { %v240_v27 = vpop.f32.mrf.mxu0 }
 0x150   :  { %vm270_vm3 = vcmp.gt.f32.partialorder %v266_v26, 0.0  ;;  %v274_v28 = vmul.f32 0.2, %v266_v26  ;;  %v259_v29 = vmul.f32 %v1627_v21, %v240_v27 }
 0x151   :  { %v242_v30 = vpop.f32.mrf.mxu0 }
 0x152   :  { %v278_v31 = vsel %vm270_vm3, %v266_v26, %v274_v28  ;;  %v267_v32 = vadd.f32 %v1628_v23, %v259_v29 }
 0x153   :  { %282 = vst.msk [vmem:[#allocation2 + $0x8] sm:$0xff] %vm18_vm0, %v278_v31  ;;  %v245_v33 = vpop.f32.mrf.mxu0 }
 0x154   :  { %vm271_vm4 = vcmp.gt.f32.partialorder %v267_v32, 0.0  ;;  %v275_v34 = vmul.f32 0.2, %v267_v32  ;;  %v260_v35 = vmul.f32 %v1627_v21, %v245_v33 }
 0x155   :  { %v247_v36 = vpop.f32.mrf.mxu0 }
 0x156   :  { %v279_v37 = vsel %vm271_vm4, %v267_v32, %v275_v34  ;;  %v268_v38 = vadd.f32 %v1628_v23, %v260_v35 }
 0x157   :  { %283 = vst.msk [vmem:[#allocation2 + $0x10] sm:$0xff] %vm18_vm0, %v279_v37  ;;  %v248_v40 = vpop.f32.mrf.mxu0 }
 0x158   :  { %vm272_vm5 = vcmp.gt.f32.partialorder %v268_v38, 0.0  ;;  %v276_v41 = vmul.f32 0.2, %v268_v38  ;;  %v261_v42 = vmul.f32 %v1627_v21, %v248_v40 }
 0x159   :  { %v250_v43 = vpop.f32.mrf.mxu0 }
 0x15a   :  { %v280_v45 = vsel %vm272_vm5, %v268_v38, %v276_v41  ;;  %v269_v46 = vadd.f32 %v1628_v23, %v261_v42  ;;  %v294_v48 = vld [vmem:[#allocation2 + $0x8] sm:$0xff] }
 0x15b   :  { %284 = vst.msk [vmem:[#allocation2 + $0x28] sm:$0xff] %vm18_vm0, %v280_v45  ;;  %v290_v55 = vld [vmem:[#allocation2 + $0x7] sm:$0xff] }
 0x15c   :  { %vm273_vm6 = vcmp.gt.f32.partialorder %v269_v46, 0.0  ;;  %v277_v47 = vmul.f32 0.2, %v269_v46  ;;  %v286_v13 = vld [vmem:[#allocation2 + $0x6] sm:$0xff] }
 0x15e   :  { %v281_v49 = vsel %vm273_vm6, %v269_v46, %v277_v47  ;;  %v302_v50 = vld [vmem:[#allocation2 + $0xa] sm:$0xff]  ;;  %v303_v51 = vld [vmem:[#allocation2 + $0x12] sm:$0xff]  ;;  %v2024_v47 = vld [vmem:[%s2547_s2] sm:$0xff]  }
 0x15f   :  { %v295_v52 = vld [vmem:[#allocation2 + $0x10] sm:$0xff]  ;;  %285 = vst.msk [vmem:[#allocation2 + $0x30] sm:$0xff] %vm18_vm0, %v281_v49  ;;  %v367_v53 = vpack.c.bf16 %v303_v51, %v302_v50  ;;  %v2023_v46 = vld [vmem:[%s2547_s2 + $0x8] sm:$0xff]   ;;  %v1661_v50 = vld [vmem:[%s2546_s3 + $0x2] ss:$0 sm:$0xff] }
 0x160   :  { %v1918_v54 = vpack.i.bf16 %v295_v52, %v294_v48  ;;  %v291_v56 = vld [vmem:[#allocation2 + $0xf] sm:$0xff]  ;;  %1822 = vmatprep.subr.bf16.mxu0 %v2023_v46  ;;  %v2025_v48 = vld [vmem:[%s2547_s2 + $0x58] sm:$0xff]   ;;  %v1662_v52 = vld [vmem:[%s2546_s3 + $0x3] ss:$0 sm:$0xff] }
 0x161   :  { %v1913_v57 = vpack.i.bf16 %v291_v56, %v290_v55  ;;  %1659 = vmatprep.mubr.msk.bf16.mxu1 %vm18_vm0, %v367_v53  ;;  %v298_v58 = vld [vmem:[#allocation2 + $0x9] sm:$0xff]  ;;  %v299_v59 = vld [vmem:[#allocation2 + $0x11] sm:$0xff]  ;;  %1823 = vmatpush3.bf16.msra.mxu0 %v2023_v46 }
 0x162   :  { %1919 = vrot.lane.b32.xlu1 %v1918_v54, %s2081_s6  ;;  %v1923_v60 = vpack.i.bf16 %v299_v59, %v298_v58  ;;  %v296_v61 = vld [vmem:[#allocation2 + $0x28] sm:$0xff]  ;;  %1824 = vmatprep.subr.bf16.mxu0 %v2024_v47  ;;  %v2026_v49 = vld [vmem:[%s2547_s2 + $0x50] sm:$0xff]  }
 0x163   :  { %1914 = vrot.lane.b32.xlu0 %v1913_v57, %s2079_s0  ;;  %v292_v63 = vld [vmem:[#allocation2 + $0x27] sm:$0xff]  ;;  %1830 = vmatprep.subr.bf16.mxu1 %v2025_v48 }
 0x164   :  { %v287_v14 = vld [vmem:[#allocation2 + $0xe] sm:$0xff]  ;;  %v288_v33 = vld [vmem:[#allocation2 + $0x26] sm:$0xff] }
 0x165   :  { %1825 = vmatpush3.bf16.msra.mxu0 %v2024_v47 }
 0x166   :  { %v297_v62 = vld [vmem:[#allocation2 + $0x30] sm:$0xff] }
 0x167   :  { %1924 = vrot.lane.b32.xlu0 %v1923_v60, %s2080_s5  ;;  %v293_v0 = vld [vmem:[#allocation2 + $0x2f] sm:$0xff]  ;;  %v1933_v1 = vpack.i.bf16 %v297_v62, %v296_v61 }
 0x168   :  { %v1928_v2 = vpack.i.bf16 %v293_v0, %v292_v63  ;;  %v300_v3 = vld [vmem:[#allocation2 + $0x29] sm:$0xff]  ;;  %v301_v5 = vld [vmem:[#allocation2 + $0x31] sm:$0xff] }
 0x169   :  { %v1938_v6 = vpack.i.bf16 %v301_v5, %v300_v3  ;;  %v304_v22 = vld [vmem:[#allocation2 + $0x2a] sm:$0xff]  ;;  %v305_v23 = vld [vmem:[#allocation2 + $0x32] sm:$0xff] }
 0x16a   :  { %1929 = vrot.lane.b32.xlu1 %v1928_v2, %s2079_s0  ;;  %v289_v34 = vld [vmem:[#allocation2 + $0x2e] sm:$0xff]  ;;  %v369_v35 = vpack.c.bf16 %v305_v23, %v304_v22 }
 0x16b   :  { %1934 = vrot.lane.b32.xlu0 %v1933_v1, %s2081_s6 }
 0x16e   :  { %1939 = vrot.lane.b32.xlu1 %v1938_v6, %s2080_s5 }
 0x1d4   :  { %v1920_v7 = vpop.permute.xlu1 %1919 }
 0x1d5   :  { %v1915_v8 = vpop.permute.xlu0 %1914  ;;  %v1922_v11 = vunpack.i.h.bf16 %v1920_v7  ;;  %v1921_v12 = vunpack.i.l.bf16 %v1920_v7 }
 0x1d6   :  { %v1917_v9 = vunpack.i.h.bf16 %v1915_v8  ;;  %v1916_v10 = vunpack.i.l.bf16 %v1915_v8 }
 0x1d8   :  { %v354_v15 = vsel %vm18_vm0, %v286_v13, %v1916_v10  ;;  %v355_v16 = vsel %vm18_vm0, %v287_v14, %v1917_v9 }
 0x1d9   :  { %v1925_v17 = vpop.permute.xlu0 %1924  ;;  %v358_v20 = vsel %vm103_vm1, %v354_v15, %v1921_v12  ;;  %v359_v21 = vsel %vm103_vm1, %v355_v16, %v1922_v11  ;;  %v2027_v15 = vld [vmem:[%s2547_s2 + $0x48] sm:$0xff]   ;;  %v2028_v16 = vld [vmem:[%s2547_s2 + $0x40] sm:$0xff]  }
 0x1da   :  { %v1927_v18 = vunpack.i.h.bf16 %v1925_v17  ;;  %v1926_v19 = vunpack.i.l.bf16 %v1925_v17 }
 0x1dc   :  { %v1930_v24 = vpop.permute.xlu1 %1929  ;;  %v362_v25 = vsel %vm108_vm2, %v358_v20, %v1926_v19  ;;  %v363_v26 = vsel %vm108_vm2, %v359_v21, %v1927_v18  ;;  %v1663_v20 = vld [vmem:[%s2546_s3 + $0x8] ss:$0 sm:$0xff] }
 0x1dd   :  { %v1935_v27 = vpop.permute.xlu0 %1934  ;;  %v1932_v28 = vunpack.i.h.bf16 %v1930_v24  ;;  %v1931_v29 = vunpack.i.l.bf16 %v1930_v24  ;;  %v366_v30 = vpack.c.bf16 %v363_v26, %v362_v25 }
 0x1de   :  { %v1937_v31 = vunpack.i.h.bf16 %v1935_v27  ;;  %v1936_v32 = vunpack.i.l.bf16 %v1935_v27 }
 0x1df   :  { %v356_v36 = vsel %vm18_vm0, %v288_v33, %v1931_v29  ;;  %v357_v37 = vsel %vm18_vm0, %v289_v34, %v1932_v28  ;;  %490 = vmatmul.mubr.bf16.vlgmr.msra.gmra.mxu1 %v366_v30  ;;  %v2029_v28 = vld [vmem:[%s2547_s2 + $0x88] sm:$0xff]   ;;  %v2030_v29 = vld [vmem:[%s2547_s2 + $0x80] sm:$0xff]   ;;  %v2031_v30 = vld [vmem:[%s2547_s2 + $0xf8] sm:$0xff]  }
 0x1e0   :  { %1660 = vmatprep.mubr.msk.bf16.mxu1 %vm18_vm0, %v369_v35  ;;  %v1940_v38 = vpop.permute.xlu1 %1939  ;;  %v360_v41 = vsel %vm103_vm1, %v356_v36, %v1936_v32  ;;  %v361_v42 = vsel %vm103_vm1, %v357_v37, %v1937_v31  ;;  %1831 = vmatpush3.bf16.msra.mxu1 %v2025_v48  ;;  %v2032_v31 = vld [vmem:[%s2547_s2 + $0xf0] sm:$0xff]   ;;  %v2033_v32 = vld [vmem:[%s2547_s2 + $0xe8] sm:$0xff]   ;;  %v2034_v33 = vld [vmem:[%s2547_s2 + $0xe0] sm:$0xff]  }
 0x1e1   :  { %v1942_v39 = vunpack.i.h.bf16 %v1940_v38  ;;  %v1941_v40 = vunpack.i.l.bf16 %v1940_v38  ;;  %1832 = vmatprep.subr.bf16.mxu1 %v2026_v49  ;;  %1842 = vmatprep.subr.bf16.mxu0 %v2029_v28  ;;  %v2035_v34 = vld [vmem:[%s2547_s2 + $0xd8] sm:$0xff]   ;;  %v1676_v36 = vld [vmem:[%s2546_s3 + $0x9] ss:$0 sm:$0xff] }
 0x1e3   :  { %v364_v43 = vsel %vm108_vm2, %v360_v41, %v1941_v40  ;;  %v365_v44 = vsel %vm108_vm2, %v361_v42, %v1942_v39 }
 0x1e4   :  { %v368_v45 = vpack.c.bf16 %v365_v44, %v364_v43  ;;  %1833 = vmatpush3.bf16.msra.mxu1 %v2026_v49 }
 0x1e5   :  { %1834 = vmatprep.subr.bf16.mxu1 %v2027_v15 }
 0x1e7   :  { %498 = vmatmul.mubr.bf16.gmra.mxu1 %v368_v45 }
 0x1e8   :  { %1835 = vmatpush3.bf16.msra.mxu1 %v2027_v15 }
 0x1e9   :  { %1836 = vmatprep.subr.bf16.mxu1 %v2028_v16 }
 0x1ec   :  { %1837 = vmatpush3.bf16.msra.mxu1 %v2028_v16 }
 0x1ed   :  { %1850 = vmatprep.subr.bf16.mxu1 %v2031_v30 }
 0x29f   :  { %v491_v51 = vpop.f32.mrf.mxu1 }
 0x2a0   :  { %v512_v53 = vmul.f32 %v1661_v50, %v491_v51 }
 0x2a1   :  { %v493_v54 = vpop.f32.mrf.mxu1 }
 0x2a2   :  { %v520_v55 = vadd.f32 %v1662_v52, %v512_v53  ;;  %v2036_v54 = vld [vmem:[%s2547_s2 + $0xd0] sm:$0xff]  }
 0x2a3   :  { %v494_v56 = vpop.f32.mrf.mxu1 }
 0x2a4   :  { %v513_v57 = vmul.f32 %v1661_v50, %v494_v56  ;;  %v528_v59 = vmul.f32 0.2, %v520_v55  ;;  %vm524_vm7 = vcmp.gt.f32.partialorder %v520_v55, 0.0  ;;  %v2038_v56 = vld [vmem:[%s2547_s2 + $0xc0] sm:$0xff]  }
 0x2a5   :  { %v496_v58 = vpop.f32.mrf.mxu1 }
 0x2a6   :  { %v521_v60 = vadd.f32 %v1662_v52, %v513_v57  ;;  %v532_v1 = vsel %vm524_vm7, %v520_v55, %v528_v59  ;;  %v2037_v55 = vld [vmem:[%s2547_s2 + $0xc8] sm:$0xff]  }
 0x2a7   :  { %v499_v61 = vpop.f32.mrf.mxu1  ;;  %v1687_v57 = vld [vmem:[%s2546_s3 + $0xa] ss:$0 sm:$0xff] }
 0x2a8   :  { %vm525_vm8 = vcmp.gt.f32.partialorder %v521_v60, 0.0  ;;  %v529_v62 = vmul.f32 0.2, %v521_v60  ;;  %v514_v63 = vmul.f32 %v1661_v50, %v499_v61 }
 0x2a9   :  { %v501_v0 = vpop.f32.mrf.mxu1 }
 0x2aa   :  { %v533_v2 = vsel %vm525_vm8, %v521_v60, %v529_v62  ;;  %v522_v3 = vadd.f32 %v1662_v52, %v514_v63 }
 0x2ab   :  { %v502_v5 = vpop.f32.mrf.mxu1  ;;  %v540_v6 = vpack.c.bf16 %v533_v2, %v532_v1 }
 0x2ac   :  { %v515_v7 = vmul.f32 %v1661_v50, %v502_v5  ;;  %v530_v9 = vmul.f32 0.2, %v522_v3  ;;  %vm526_vm9 = vcmp.gt.f32.partialorder %v522_v3, 0.0 }
 0x2ad   :  { %v504_v8 = vpop.f32.mrf.mxu1  ;;  %1826 = vmatprep.mubr.msk.bf16.mxu0 %vm18_vm0, %v540_v6 }
 0x2ae   :  { %v523_v10 = vadd.f32 %v1662_v52, %v515_v7  ;;  %v534_v12 = vsel %vm526_vm9, %v522_v3, %v530_v9 }
 0x2b0   :  { %vm527_vm10 = vcmp.gt.f32.partialorder %v523_v10, 0.0  ;;  %v531_v11 = vmul.f32 0.2, %v523_v10 }
 0x2b2   :  { %v535_v13 = vsel %vm527_vm10, %v523_v10, %v531_v11 }
 0x2b3   :  { %v541_v14 = vpack.c.bf16 %v535_v13, %v534_v12 }
 0x2b5   :  { %1827 = vmatmul.mubr.msk.bf16.vlgmr.msra.gmra.mxu0 %vm18_vm0, %v541_v14 }
 0x2b6   :  { %1843 = vmatpush3.bf16.msra.mxu0 %v2029_v28 }
 0x2b7   :  { %1844 = vmatprep.subr.bf16.mxu0 %v2030_v29 }
 0x2ba   :  { %1845 = vmatpush3.bf16.msra.mxu0 %v2030_v29 }
 0x2bb   :  { %1191 = vmatprep.subr.bf16.mxu0 %v2078_v4 }
 0x375   :  { %v1828_v17 = vpop.f32.mrf.mxu0 }
 0x376   :  { %v608_v25 = vadd.f32 %v1828_v17, %v1663_v20 }
 0x377   :  { %v599_v18 = vpop.f32.mrf.mxu0 }
 0x378   :  { %v600_v23 = vadd.f32 %v1663_v20, %v599_v18 }
 0x379   :  { %v1829_v19 = vpop.f32.mrf.mxu0 }
 0x37a   :  { %v611_v21 = vadd.f32 %v1829_v19, %v1663_v20 }
 0x37b   :  { %v602_v22 = vpop.f32.mrf.mxu0 }
 0x37c   :  { %v603_v24 = vadd.f32 %v1663_v20, %v602_v22  ;;  %v624_v27 = vpack.c.bf16 %v611_v21, %v608_v25 }
 0x37e   :  { %v623_v26 = vpack.c.bf16 %v603_v24, %v600_v23 }
 0x380   :  { %1838 = vmatprep.mubr.msk.bf16.mxu1 %vm103_vm1, %v623_v26  ;;  %v800_v26 = vlaneseq }
 0x381   :  { %1839 = vmatmul.mubr.msk.bf16.vlgmr.msra.gmra.mxu1 %vm103_vm1, %v624_v27 }
 0x382   :  { %1851 = vmatpush3.bf16.msra.mxu1 %v2031_v30  ;;  %v801_v29 = vand.u32 127, %v800_v26 }
 0x383   :  { %1852 = vmatprep.subr.bf16.mxu1 %v2032_v31 }
 0x384   :  { %vm802_vm15 = vcmp.lt.s32.totalorder %v801_v29, 64 }
 0x386   :  { %1853 = vmatpush3.bf16.msra.mxu1 %v2032_v31 }
 0x387   :  { %1854 = vmatprep.subr.bf16.mxu1 %v2033_v32 }
 0x38a   :  { %1855 = vmatpush3.bf16.msra.mxu1 %v2033_v32 }
 0x38b   :  { %1856 = vmatprep.subr.bf16.mxu1 %v2034_v33 }
 0x38e   :  { %1857 = vmatpush3.bf16.msra.mxu1 %v2034_v33 }
 0x38f   :  { %1858 = vmatprep.subr.bf16.mxu1 %v2035_v34 }
 0x392   :  { %1859 = vmatpush3.bf16.msra.mxu1 %v2035_v34 }
 0x393   :  { %1860 = vmatprep.subr.bf16.mxu1 %v2036_v54 }
 0x396   :  { %1861 = vmatpush3.bf16.msra.mxu1 %v2036_v54 }
 0x397   :  { %1862 = vmatprep.subr.bf16.mxu1 %v2037_v55 }
 0x39a   :  { %1863 = vmatpush3.bf16.msra.mxu1 %v2037_v55 }
 0x39b   :  { %1864 = vmatprep.subr.bf16.mxu1 %v2038_v56 }
 0x39e   :  { %1865 = vmatpush3.bf16.msra.mxu1 %v2038_v56 }
 0x39f   :  { %1445 = vmatprep.subr.bf16.mxu1 %v2078_v4 }
 0x441   :  { %v1840_v35 = vpop.f32.mrf.mxu1 }
 0x442   :  { %v703_v39 = vadd.f32 %v1840_v35, %v1676_v36 }
 0x443   :  { %v694_v37 = vpop.f32.mrf.mxu1 }
 0x444   :  { %v695_v38 = vadd.f32 %v1676_v36, %v694_v37  ;;  %v715_v46 = vmul.f32 0.2, %v703_v39  ;;  %vm711_vm13 = vcmp.gt.f32.partialorder %v703_v39, 0.0 }
 0x445   :  { %v1841_v40 = vpop.f32.mrf.mxu1 }
 0x446   :  { %v706_v41 = vadd.f32 %v1841_v40, %v1676_v36  ;;  %v713_v43 = vmul.f32 0.2, %v695_v38  ;;  %vm709_vm12 = vcmp.gt.f32.partialorder %v695_v38, 0.0  ;;  %v719_v51 = vsel %vm711_vm13, %v703_v39, %v715_v46 }
 0x447   :  { %v697_v42 = vpop.f32.mrf.mxu1 }
 0x448   :  { %vm712_vm11 = vcmp.gt.f32.partialorder %v706_v41, 0.0  ;;  %v716_v44 = vmul.f32 0.2, %v706_v41  ;;  %v698_v45 = vadd.f32 %v1676_v36, %v697_v42  ;;  %v717_v49 = vsel %vm709_vm12, %v695_v38, %v713_v43 }
 0x44a   :  { %vm710_vm14 = vcmp.gt.f32.partialorder %v698_v45, 0.0  ;;  %v714_v47 = vmul.f32 0.2, %v698_v45  ;;  %v720_v48 = vsel %vm712_vm11, %v706_v41, %v716_v44 }
 0x44b   :  { %v727_v53 = vpack.c.bf16 %v720_v48, %v719_v51 }
 0x44c   :  { %v718_v50 = vsel %vm710_vm14, %v698_v45, %v714_v47 }
 0x44d   :  { %v726_v52 = vpack.c.bf16 %v718_v50, %v717_v49 }
 0x44f   :  { %1846 = vmatprep.mubr.msk.bf16.mxu0 %vm18_vm0, %v726_v52 }
 0x450   :  { %1847 = vmatmul.mubr.msk.bf16.vlgmr.msra.gmra.mxu0 %vm18_vm0, %v727_v53 }
 0x510   :  { %v1848_v58 = vpop.f32.mrf.mxu0 }
 0x511   :  { %v2328_v59 = vadd.f32 %v1848_v58, %v1687_v57 }
 0x512   :  { %v785_v60 = vpop.f32.mrf.mxu0 }
 0x513   :  { %v817_v61 = vand.u32 2147483647, %v2328_v59  ;;  %v2331_v62 = vadd.f32 %v1687_v57, %v785_v60  ;;  %v805_v39 = vmax.f32 %v2328_v59, 0.0  ;;  %vm809_vm5 = vcmp.ne.f32.partialorder %v2328_v59, %v2328_v59 }
 0x514   :  { %v1849_v63 = vpop.f32.mrf.mxu0 }
 0x515   :  { %v821_v0 = vsub.f32 0.0, %v817_v61  ;;  %v815_v1 = vand.u32 2147483647, %v2331_v62  ;;  %v2334_v2 = vadd.f32 %v1849_v63, %v1687_v57  ;;  %v803_v46 = vmax.f32 %v2331_v62, 0.0 }
 0x516   :  { %v788_v3 = vpop.f32.mrf.mxu0  ;;  %vm807_vm6 = vcmp.ne.f32.partialorder %v2331_v62, %v2331_v62 }
 0x517   :  { %v827_v5 = vmul.f32 1.442695, %v821_v0  ;;  %v819_v6 = vsub.f32 0.0, %v815_v1  ;;  %v2336_v7 = vadd.f32 %v1687_v57, %v788_v3  ;;  %v818_v8 = vand.u32 2147483647, %v2334_v2 }
 0x518   :  { %v901_v13 = vpack.c.bf16 %v2334_v2, %v2328_v59  ;;  %v806_v57 = vmax.f32 %v2334_v2, 0.0  ;;  %vm810_vm9 = vcmp.ne.f32.partialorder %v2334_v2, %v2334_v2 }
 0x519   :  { %2061 = vpow2.f32 %v827_v5  ;;  %v823_v9 = vmul.f32 1.442695, %v819_v6  ;;  %v822_v10 = vsub.f32 0.0, %v818_v8  ;;  %v816_v11 = vand.u32 2147483647, %v2336_v7 }
 0x51a   :  { %v900_v12 = vpack.c.bf16 %v2336_v7, %v2331_v62  ;;  %v804_v58 = vmax.f32 %v2336_v7, 0.0  ;;  %vm808_vm10 = vcmp.ne.f32.partialorder %v2336_v7, %v2336_v7 }
 0x51b   :  { %2063 = vpow2.f32 %v823_v9  ;;  %v829_v14 = vmul.f32 1.442695, %v822_v10  ;;  %v820_v15 = vsub.f32 0.0, %v816_v11 }
 0x51c   :  { %1866 = vmatprep.mubr.bf16.mxu1 %v900_v12 }
 0x51d   :  { %1867 = vmatmul.mubr.bf16.vlgmr.msra.gmra.mxu1 %v901_v13  ;;  %2065 = vpow2.f32 %v829_v14  ;;  %v825_v16 = vmul.f32 1.442695, %v820_v15  ;;  %v2039_v14 = vld [vmem:[%s2545_s1 + $0xd8] sm:$0xff]   ;;  %v2042_v15 = vld [vmem:[%s2545_s1 + $0xc0] sm:$0xff]  }
 0x51e   :  { %1192 = vmatpush1.bf16.msra.mxu0 %v2039_v14 }
 0x51f   :  { %2067 = vpow2.f32 %v825_v16  ;;  %1193 = vmatprep.subr.bf16.mxu0 %v2078_v4  ;;  %v2043_v16 = vld [vmem:[%s2545_s1 + $0xb8] sm:$0xff]  }
 0x526   :  { %v2062_v17 = vpop.eup %2061 }
 0x527   :  { %v849_v18 = vadd.f32 1.0, %v2062_v17  ;;  %v852_v25 = vmul.f32 -0.5, %v2062_v17  ;;  %v855_v30 = vand.u32 2147483647, %v2062_v17 }
 0x528   :  { %v2064_v19 = vpop.eup %2063 }
 0x529   :  { %2069 = vlog2.f32 %v849_v18  ;;  %v831_v20 = vadd.f32 1.0, %v2064_v19  ;;  %v834_v27 = vmul.f32 -0.5, %v2064_v19  ;;  %v853_v28 = vadd.f32 1.0, %v852_v25  ;;  %v2045_v18 = vld [vmem:[%s2545_s1 + $0xa8] sm:$0xff]  }
 0x52a   :  { %v2066_v21 = vpop.eup %2065  ;;  %v837_v34 = vand.u32 2147483647, %v2064_v19  ;;  %vm856_vm3 = vcmp.lt.f32.partialorder %v855_v30, 0.0004427343 }
 0x52b   :  { %2071 = vlog2.f32 %v831_v20  ;;  %v858_v22 = vadd.f32 1.0, %v2066_v21  ;;  %v861_v31 = vmul.f32 -0.5, %v2066_v21  ;;  %v835_v32 = vadd.f32 1.0, %v834_v27  ;;  %v1708_v20 = vld [vmem:[%s2546_s3 + $0xb] ss:$0 sm:$0xff] }
 0x52c   :  { %v2068_v23 = vpop.eup %2067  ;;  %v854_v37 = vmul.f32 %v2062_v17, %v853_v28  ;;  %v864_v44 = vand.u32 2147483647, %v2066_v21  ;;  %vm838_vm4 = vcmp.lt.f32.partialorder %v837_v34, 0.0004427343  ;;  %v2044_v17 = vld [vmem:[%s2545_s1 + $0xb0] sm:$0xff]  }
 0x52d   :  { %2073 = vlog2.f32 %v858_v22  ;;  %v840_v24 = vadd.f32 1.0, %v2068_v23  ;;  %v843_v35 = vmul.f32 -0.5, %v2068_v23  ;;  %v862_v40 = vadd.f32 1.0, %v861_v31 }
 0x52e   :  { %v836_v43 = vmul.f32 %v2064_v19, %v835_v32  ;;  %v846_v50 = vand.u32 2147483647, %v2068_v23  ;;  %vm865_vm7 = vcmp.lt.f32.partialorder %v864_v44, 0.0004427343  ;;  %v2046_v19 = vld [vmem:[%s2545_s1 + $0xa0] sm:$0xff]  }
 0x52f   :  { %2075 = vlog2.f32 %v840_v24  ;;  %v844_v47 = vadd.f32 1.0, %v843_v35  ;;  %v863_v54 = vmul.f32 %v2066_v21, %v862_v40 }
 0x530   :  { %vm847_vm8 = vcmp.lt.f32.partialorder %v846_v50, 0.0004427343 }
 0x531   :  { %v845_v0 = vmul.f32 %v2068_v23, %v844_v47 }
 0x536   :  { %v2070_v33 = vpop.eup %2069 }
 0x537   :  { %v851_v36 = vmul.f32 0.6931472, %v2070_v33 }
 0x538   :  { %v2072_v38 = vpop.eup %2071 }
 0x539   :  { %v857_v41 = vsel %vm856_vm3, %v854_v37, %v851_v36  ;;  %v833_v42 = vmul.f32 0.6931472, %v2072_v38  ;;  %v2047_v37 = vld [vmem:[%s2545_s1 + $0xe8] sm:$0xff]   ;;  %v2048_v38 = vld [vmem:[%s2545_s1 + $0xe0] sm:$0xff]  }
 0x53a   :  { %v869_v45 = vadd.f32 %v857_v41, %v805_v39  ;;  %v2074_v48 = vpop.eup %2073 }
 0x53b   :  { %v839_v49 = vsel %vm838_vm4, %v836_v43, %v833_v42  ;;  %v860_v53 = vmul.f32 0.6931472, %v2074_v48 }
 0x53c   :  { %v873_v51 = vsel %vm809_vm5, %v2328_v59, %v869_v45  ;;  %v867_v52 = vadd.f32 %v839_v49, %v803_v46  ;;  %v2076_v55 = vpop.eup %2075 }
 0x53d   :  { %v877_v56 = vadd.f32 0.0001, %v873_v51  ;;  %v866_v61 = vsel %vm865_vm7, %v863_v54, %v860_v53  ;;  %v842_v63 = vmul.f32 0.6931472, %v2076_v55 }
 0x53e   :  { %v871_v60 = vsel %vm807_vm6, %v2331_v62, %v867_v52  ;;  %v870_v5 = vadd.f32 %v866_v61, %v806_v57 }
 0x53f   :  { %v881_v1 = vsel %vm802_vm15, %v2328_v59, %v877_v56  ;;  %v875_v3 = vadd.f32 0.0001, %v871_v60  ;;  %v848_v6 = vsel %vm847_vm8, %v845_v0, %v842_v63 }
 0x540   :  { %1607 = vst [vmem:[%s2548_s4 + $0x20] sm:$0xff] %v881_v1  ;;  %v874_v9 = vsel %vm810_vm9, %v2334_v2, %v870_v5  ;;  %v868_v10 = vadd.f32 %v848_v6, %v804_v58 }
 0x541   :  { %v879_v8 = vsel %vm802_vm15, %v2331_v62, %v875_v3  ;;  %v878_v11 = vadd.f32 0.0001, %v874_v9 }
 0x542   :  { %1603 = vst [vmem:[%s2548_s4] sm:$0xff] %v879_v8  ;;  %v872_v59 = vsel %vm808_vm10, %v2336_v7, %v868_v10 }
 0x543   :  { %v882_v12 = vsel %vm802_vm15, %v2334_v2, %v878_v11  ;;  %v876_v13 = vadd.f32 0.0001, %v872_v59  ;;  %v2040_v2 = vld [vmem:[%s2545_s1 + $0xd0] sm:$0xff]  }
 0x544   :  { %1609 = vst [vmem:[%s2548_s4 + $0x30] sm:$0xff] %v882_v12  ;;  %1194 = vmatpush1.bf16.msra.mxu0 %v2040_v2 }
 0x545   :  { %v880_v62 = vsel %vm802_vm15, %v2336_v7, %v876_v13  ;;  %v2041_v7 = vld [vmem:[%s2545_s1 + $0xc8] sm:$0xff]   ;;  %1195 = vmatprep.subr.bf16.mxu0 %v2078_v4 }
 0x546   :  { %1605 = vst [vmem:[%s2548_s4 + $0x10] sm:$0xff] %v880_v62 }
 0x548   :  { %1196 = vmatpush1.bf16.msra.mxu0 %v2041_v7 }
 0x549   :  { %1197 = vmatprep.subr.bf16.mxu0 %v2078_v4 }
 0x54c   :  { %1198 = vmatpush1.bf16.msra.mxu0 %v2042_v15 }
 0x54d   :  { %1199 = vmatprep.subr.bf16.mxu0 %v2078_v4 }
 0x550   :  { %1200 = vmatpush1.bf16.msra.mxu0 %v2043_v16 }
 0x551   :  { %1201 = vmatprep.subr.bf16.mxu0 %v2078_v4 }
 0x554   :  { %1202 = vmatpush1.bf16.msra.mxu0 %v2044_v17 }
 0x555   :  { %1203 = vmatprep.subr.bf16.mxu0 %v2078_v4 }
 0x558   :  { %1204 = vmatpush1.bf16.msra.mxu0 %v2045_v18 }
 0x559   :  { %1205 = vmatprep.subr.bf16.mxu0 %v2078_v4 }
 0x55c   :  { %1206 = vmatpush1.bf16.msra.mxu0 %v2046_v19 }
 0x55d   :  { %1219 = vmatprep.subr.bf16.mxu0 %v2078_v4 }
 0x560   :  { %1220 = vmatpush2.bf16.msra.mxu0 %v2047_v37  ;;  %v2050_v37 = vld [vmem:[%s2545_s1 + $0x120] sm:$0xff]  }
 0x561   :  { %1221 = vmatprep.subr.bf16.mxu0 %v2078_v4 }
 0x564   :  { %1222 = vmatpush2.bf16.msra.mxu0 %v2048_v38  ;;  %v2051_v38 = vld [vmem:[%s2545_s1 + $0x118] sm:$0xff]  }
 0x5dd   :  { %v1868_v21 = vpop.f32.mrf.mxu1 }
 0x5de   :  { %v998_v22 = vadd.f32 %v1868_v21, %v1708_v20 }
 0x5df   :  { %v989_v23 = vpop.f32.mrf.mxu1 }
 0x5e0   :  { %vm1006_vm11 = vcmp.gt.f32.partialorder %v998_v22, 0.0  ;;  %v1010_v24 = vmul.f32 0.2, %v998_v22  ;;  %v990_v25 = vadd.f32 %v1708_v20, %v989_v23 }
 0x5e1   :  { %v1869_v26 = vpop.f32.mrf.mxu1 }
 0x5e2   :  { %v1014_v27 = vsel %vm1006_vm11, %v998_v22, %v1010_v24  ;;  %vm1004_vm12 = vcmp.gt.f32.partialorder %v990_v25, 0.0  ;;  %v1008_v28 = vmul.f32 0.2, %v990_v25  ;;  %v1001_v29 = vadd.f32 %v1869_v26, %v1708_v20 }
 0x5e3   :  { %1018 = vst.msk [vmem:[#allocation2 + $0x28] sm:$0xff] %vm18_vm0, %v1014_v27  ;;  %v992_v30 = vpop.f32.mrf.mxu1 }
 0x5e4   :  { %v1012_v31 = vsel %vm1004_vm12, %v990_v25, %v1008_v28  ;;  %vm1007_vm13 = vcmp.gt.f32.partialorder %v1001_v29, 0.0  ;;  %v1011_v32 = vmul.f32 0.2, %v1001_v29  ;;  %v993_v33 = vadd.f32 %v1708_v20, %v992_v30 }
 0x5e5   :  { %1016 = vst.msk [vmem:[#allocation2 + $0x8] sm:$0xff] %vm18_vm0, %v1012_v31 }
 0x5e6   :  { %v1015_v34 = vsel %vm1007_vm13, %v1001_v29, %v1011_v32  ;;  %vm1005_vm14 = vcmp.gt.f32.partialorder %v993_v33, 0.0  ;;  %v1009_v35 = vmul.f32 0.2, %v993_v33 }
 0x5e7   :  { %1019 = vst.msk [vmem:[#allocation2 + $0x30] sm:$0xff] %vm18_vm0, %v1015_v34 }
 0x5e8   :  { %v1013_v36 = vsel %vm1005_vm14, %v993_v33, %v1009_v35 }
 0x5e9   :  { %1017 = vst.msk [vmem:[#allocation2 + $0x10] sm:$0xff] %vm18_vm0, %v1013_v36  ;;  %v2049_v36 = vld [vmem:[%s2545_s1 + $0x128] sm:$0xff]  }
 0x5ea   :  { %v1026_v51 = vld [vmem:[#allocation2 + $0x27] sm:$0xff]  ;;  %1446 = vmatpush1.bf16.msra.mxu1 %v2049_v36 }
 0x5eb   :  { %v1030_v58 = vld [vmem:[#allocation2 + $0x28] sm:$0xff]  ;;  %1447 = vmatprep.subr.bf16.mxu1 %v2078_v4 }
 0x5ec   :  { %v1028_v39 = vld [vmem:[#allocation2 + $0x8] sm:$0xff] }
 0x5ed   :  { %v1024_v45 = vld [vmem:[#allocation2 + $0x7] sm:$0xff] }
 0x5ee   :  { %v1027_v48 = vld [vmem:[#allocation2 + $0x2f] sm:$0xff]  ;;  %v1020_v6 = vld [vmem:[#allocation2 + $0x6] sm:$0xff]  ;;  %1448 = vmatpush1.bf16.msra.mxu1 %v2050_v37 }
 0x5ef   :  { %v1958_v52 = vpack.i.bf16 %v1027_v48, %v1026_v51  ;;  %v1034_v54 = vld [vmem:[#allocation2 + $0x29] sm:$0xff]  ;;  %v1035_v55 = vld [vmem:[#allocation2 + $0x31] sm:$0xff]  ;;  %1449 = vmatprep.subr.bf16.mxu1 %v2078_v4 }
 0x5f0   :  { %v1036_v40 = vld [vmem:[#allocation2 + $0xa] sm:$0xff]  ;;  %v1037_v41 = vld [vmem:[#allocation2 + $0x12] sm:$0xff]  ;;  %v1968_v57 = vpack.i.bf16 %v1035_v55, %v1034_v54 }
 0x5f1   :  { %v1029_v42 = vld [vmem:[#allocation2 + $0x10] sm:$0xff]  ;;  %v1101_v43 = vpack.c.bf16 %v1037_v41, %v1036_v40  ;;  %v1022_v23 = vld [vmem:[#allocation2 + $0x26] sm:$0xff] }
 0x5f2   :  { %v1948_v44 = vpack.i.bf16 %v1029_v42, %v1028_v39  ;;  %v1025_v46 = vld [vmem:[#allocation2 + $0xf] sm:$0xff]  ;;  %1450 = vmatpush1.bf16.msra.mxu1 %v2051_v38  ;;  %v2054_v41 = vld [vmem:[%s2545_s1 + $0x100] sm:$0xff]   ;;  %v2055_v42 = vld [vmem:[%s2545_s1 + $0xf8] sm:$0xff]  }
 0x5f3   :  { %v1943_v47 = vpack.i.bf16 %v1025_v46, %v1024_v45  ;;  %1747 = vmatprep.mubr.msk.bf16.mxu0 %vm18_vm0, %v1101_v43  ;;  %v1032_v49 = vld [vmem:[#allocation2 + $0x9] sm:$0xff]  ;;  %v1033_v50 = vld [vmem:[#allocation2 + $0x11] sm:$0xff]  ;;  %1451 = vmatprep.subr.bf16.mxu1 %v2078_v4  ;;  %v1750_v46 = vld [vmem:[%s2546_s3 + $0x5] ss:$0 sm:$0xff] }
 0x5f4   :  { %1949 = vrot.lane.b32.xlu1 %v1948_v44, %s2081_s6  ;;  %v1953_v53 = vpack.i.bf16 %v1033_v50, %v1032_v49  ;;  %v1031_v56 = vld [vmem:[#allocation2 + $0x30] sm:$0xff]  ;;  %v2053_v40 = vld [vmem:[%s2545_s1 + $0x108] sm:$0xff]   ;;  %v1749_v44 = vld [vmem:[%s2546_s3 + $0x4] ss:$0 sm:$0xff] }
 0x5f5   :  { %1944 = vrot.lane.b32.xlu0 %v1943_v47, %s2079_s0  ;;  %v1963_v60 = vpack.i.bf16 %v1031_v56, %v1030_v58  ;;  %v1021_v8 = vld [vmem:[#allocation2 + $0xe] sm:$0xff] }
 0x5f6   :  { %v1038_v62 = vld [vmem:[#allocation2 + $0x2a] sm:$0xff]  ;;  %v1039_v14 = vld [vmem:[#allocation2 + $0x32] sm:$0xff] }
 0x5f7   :  { %v1103_v22 = vpack.c.bf16 %v1039_v14, %v1038_v62  ;;  %v1023_v24 = vld [vmem:[#allocation2 + $0x2e] sm:$0xff] }
 0x5f8   :  { %1959 = vrot.lane.b32.xlu1 %v1958_v52, %s2079_s0  ;;  %v2052_v39 = vld [vmem:[%s2545_s1 + $0x110] sm:$0xff]  }
 0x5f9   :  { %1954 = vrot.lane.b32.xlu0 %v1953_v53, %s2080_s5  ;;  %1452 = vmatpush1.bf16.msra.mxu1 %v2052_v39  ;;  %v2056_v43 = vld [vmem:[%s2545_s1 + $0xf0] sm:$0xff]  }
 0x5fa   :  { %1453 = vmatprep.subr.bf16.mxu1 %v2078_v4 }
 0x5fc   :  { %1969 = vrot.lane.b32.xlu1 %v1968_v57, %s2080_s5 }
 0x5fd   :  { %1964 = vrot.lane.b32.xlu0 %v1963_v60, %s2081_s6  ;;  %1454 = vmatpush1.bf16.msra.mxu1 %v2053_v40 }
 0x5fe   :  { %1455 = vmatprep.subr.bf16.mxu1 %v2078_v4 }
 0x601   :  { %1456 = vmatpush1.bf16.msra.mxu1 %v2054_v41 }
 0x602   :  { %1457 = vmatprep.subr.bf16.mxu1 %v2078_v4 }
 0x605   :  { %1458 = vmatpush1.bf16.msra.mxu1 %v2055_v42 }
 0x606   :  { %1459 = vmatprep.subr.bf16.mxu1 %v2078_v4 }
 0x609   :  { %1460 = vmatpush1.bf16.msra.mxu1 %v2056_v43 }
 0x60a   :  { %1473 = vmatprep.subr.bf16.mxu1 %v2078_v4 }
 0x666   :  { %v1950_v61 = vpop.permute.xlu1 %1949 }
 0x667   :  { %v1945_v63 = vpop.permute.xlu0 %1944  ;;  %v1952_v3 = vunpack.i.h.bf16 %v1950_v61  ;;  %v1951_v5 = vunpack.i.l.bf16 %v1950_v61 }
 0x668   :  { %v1947_v0 = vunpack.i.h.bf16 %v1945_v63  ;;  %v1946_v1 = vunpack.i.l.bf16 %v1945_v63 }
 0x66a   :  { %v1088_v9 = vsel %vm18_vm0, %v1020_v6, %v1946_v1  ;;  %v1089_v10 = vsel %vm18_vm0, %v1021_v8, %v1947_v0  ;;  %v1960_v11 = vpop.permute.xlu1 %1959  ;;  %v2057_v1 = vld [vmem:[%s2545_s1 + $0x138] sm:$0xff]  }
 0x66b   :  { %v1955_v59 = vpop.permute.xlu0 %1954  ;;  %v1962_v2 = vunpack.i.h.bf16 %v1960_v11  ;;  %v1961_v7 = vunpack.i.l.bf16 %v1960_v11  ;;  %v1092_v15 = vsel %vm103_vm1, %v1088_v9, %v1951_v5  ;;  %v1093_v16 = vsel %vm103_vm1, %v1089_v10, %v1952_v3  ;;  %1474 = vmatpush2.bf16.msra.mxu1 %v2057_v1  ;;  %v2058_v10 = vld [vmem:[%s2545_s1 + $0x130] sm:$0xff]  }
 0x66c   :  { %v1957_v12 = vunpack.i.h.bf16 %v1955_v59  ;;  %v1956_v13 = vunpack.i.l.bf16 %v1955_v59  ;;  %1475 = vmatprep.subr.bf16.mxu1 %v2078_v4 }
 0x66d   :  { %v1091_v29 = vsel %vm18_vm0, %v1023_v24, %v1962_v2  ;;  %v1090_v30 = vsel %vm18_vm0, %v1022_v23, %v1961_v7 }
 0x66e   :  { %v1096_v17 = vsel %vm108_vm2, %v1092_v15, %v1956_v13  ;;  %v1097_v18 = vsel %vm108_vm2, %v1093_v16, %v1957_v12  ;;  %v1970_v19 = vpop.permute.xlu1 %1969 }
 0x66f   :  { %v1100_v20 = vpack.c.bf16 %v1097_v18, %v1096_v17  ;;  %v1965_v21 = vpop.permute.xlu0 %1964  ;;  %v1972_v25 = vunpack.i.h.bf16 %v1970_v19  ;;  %v1971_v26 = vunpack.i.l.bf16 %v1970_v19  ;;  %1476 = vmatpush2.bf16.msra.mxu1 %v2058_v10  ;;  %v2060_v10 = vld [vmem:[%s2547_s2 + $0x100] sm:$0xff]  }
 0x670   :  { %v1967_v27 = vunpack.i.h.bf16 %v1965_v21  ;;  %v1966_v28 = vunpack.i.l.bf16 %v1965_v21 }
 0x671   :  { %1224 = vmatmul.mubr.bf16.vlgmr.msra.gmra.mxu0 %v1100_v20 }
 0x672   :  { %v1095_v31 = vsel %vm103_vm1, %v1091_v29, %v1967_v27  ;;  %v1094_v32 = vsel %vm103_vm1, %v1090_v30, %v1966_v28  ;;  %1748 = vmatprep.mubr.msk.bf16.mxu0 %vm18_vm0, %v1103_v22 }
 0x673   :  { %v1098_v33 = vsel %vm108_vm2, %v1094_v32, %v1971_v26  ;;  %v1099_v34 = vsel %vm108_vm2, %v1095_v31, %v1972_v25 }
 0x674   :  { %v1102_v35 = vpack.c.bf16 %v1099_v34, %v1098_v33 }
 0x679   :  { %1232 = vmatmul.mubr.bf16.gmra.mxu0 %v1102_v35 }
 0x731   :  { %v1225_v45 = vpop.f32.mrf.mxu0 }
 0x732   :  { %v1246_v47 = vmul.f32 %v1749_v44, %v1225_v45 }
 0x733   :  { %v1227_v48 = vpop.f32.mrf.mxu0 }
 0x734   :  { %v1254_v49 = vadd.f32 %v1750_v46, %v1246_v47 }
 0x735   :  { %v1228_v50 = vpop.f32.mrf.mxu0 }
 0x736   :  { %vm1258_vm15 = vcmp.gt.f32.partialorder %v1254_v49, 0.0  ;;  %v1262_v51 = vmul.f32 0.2, %v1254_v49  ;;  %v1247_v52 = vmul.f32 %v1749_v44, %v1228_v50 }
 0x737   :  { %v1230_v53 = vpop.f32.mrf.mxu0 }
 0x738   :  { %v1266_v54 = vsel %vm1258_vm15, %v1254_v49, %v1262_v51  ;;  %v1255_v55 = vadd.f32 %v1750_v46, %v1247_v52 }
 0x739   :  { %1270 = vst.msk [vmem:[#allocation2 + $0x8] sm:$0xff] %vm18_vm0, %v1266_v54  ;;  %v1233_v56 = vpop.f32.mrf.mxu0 }
 0x73a   :  { %vm1259_vm3 = vcmp.gt.f32.partialorder %v1255_v55, 0.0  ;;  %v1263_v57 = vmul.f32 0.2, %v1255_v55  ;;  %v1248_v58 = vmul.f32 %v1749_v44, %v1233_v56 }
 0x73b   :  { %v1235_v60 = vpop.f32.mrf.mxu0 }
 0x73c   :  { %v1267_v61 = vsel %vm1259_vm3, %v1255_v55, %v1263_v57  ;;  %v1256_v63 = vadd.f32 %v1750_v46, %v1248_v58 }
 0x73d   :  { %1271 = vst.msk [vmem:[#allocation2 + $0x10] sm:$0xff] %vm18_vm0, %v1267_v61  ;;  %v1236_v0 = vpop.f32.mrf.mxu0 }
 0x73e   :  { %vm1260_vm4 = vcmp.gt.f32.partialorder %v1256_v63, 0.0  ;;  %v1264_v3 = vmul.f32 0.2, %v1256_v63  ;;  %v1249_v5 = vmul.f32 %v1749_v44, %v1236_v0 }
 0x73f   :  { %v1238_v6 = vpop.f32.mrf.mxu0 }
 0x740   :  { %v1268_v8 = vsel %vm1260_vm4, %v1256_v63, %v1264_v3  ;;  %v1257_v9 = vadd.f32 %v1750_v46, %v1249_v5  ;;  %v1282_v59 = vld [vmem:[#allocation2 + $0x8] sm:$0xff] }
 0x741   :  { %1272 = vst.msk [vmem:[#allocation2 + $0x28] sm:$0xff] %vm18_vm0, %v1268_v8  ;;  %v1278_v15 = vld [vmem:[#allocation2 + $0x7] sm:$0xff] }
 0x742   :  { %vm1261_vm5 = vcmp.gt.f32.partialorder %v1257_v9, 0.0  ;;  %v1265_v11 = vmul.f32 0.2, %v1257_v9  ;;  %v1274_v35 = vld [vmem:[#allocation2 + $0x6] sm:$0xff] }
 0x744   :  { %v1269_v12 = vsel %vm1261_vm5, %v1257_v9, %v1265_v11  ;;  %v1290_v13 = vld [vmem:[#allocation2 + $0xa] sm:$0xff]  ;;  %v1291_v62 = vld [vmem:[#allocation2 + $0x12] sm:$0xff]  ;;  %v1783_v11 = vld [vmem:[%s2546_s3 + $0x6] ss:$0 sm:$0xff] }
 0x745   :  { %v1283_v14 = vld [vmem:[#allocation2 + $0x10] sm:$0xff]  ;;  %1273 = vst.msk [vmem:[#allocation2 + $0x30] sm:$0xff] %vm18_vm0, %v1269_v12  ;;  %v1355_v2 = vpack.c.bf16 %v1291_v62, %v1290_v13  ;;  %v2059_v9 = vld [vmem:[%s2547_s2 + $0x108] sm:$0xff]   ;;  %v1784_v12 = vld [vmem:[%s2546_s3 + $0x7] ss:$0 sm:$0xff] }
 0x746   :  { %v1978_v7 = vpack.i.bf16 %v1283_v14, %v1282_v59  ;;  %v1279_v4 = vld [vmem:[#allocation2 + $0xf] sm:$0xff]  ;;  %1870 = vmatprep.subr.bf16.mxu0 %v2059_v9 }
 0x747   :  { %v1973_v16 = vpack.i.bf16 %v1279_v4, %v1278_v15  ;;  %1781 = vmatprep.mubr.msk.bf16.mxu1 %vm18_vm0, %v1355_v2  ;;  %v1286_v17 = vld [vmem:[#allocation2 + $0x9] sm:$0xff]  ;;  %v1287_v18 = vld [vmem:[#allocation2 + $0x11] sm:$0xff]  ;;  %1871 = vmatpush3.bf16.msra.mxu0 %v2059_v9 }
 0x748   :  { %1979 = vrot.lane.b32.xlu1 %v1978_v7, %s2081_s6  ;;  %v1983_v19 = vpack.i.bf16 %v1287_v18, %v1286_v17  ;;  %v1284_v20 = vld [vmem:[#allocation2 + $0x28] sm:$0xff]  ;;  %1872 = vmatprep.subr.bf16.mxu0 %v2060_v10 }
 0x749   :  { %1974 = vrot.lane.b32.xlu0 %v1973_v16, %s2079_s0  ;;  %v1280_v22 = vld [vmem:[#allocation2 + $0x27] sm:$0xff] }
 0x74a   :  { %v1275_v36 = vld [vmem:[#allocation2 + $0xe] sm:$0xff]  ;;  %v1276_v55 = vld [vmem:[#allocation2 + $0x26] sm:$0xff] }
 0x74b   :  { %1873 = vmatpush3.bf16.msra.mxu0 %v2060_v10 }
 0x74c   :  { %v1285_v21 = vld [vmem:[#allocation2 + $0x30] sm:$0xff] }
 0x74d   :  { %1984 = vrot.lane.b32.xlu0 %v1983_v19, %s2080_s5  ;;  %v1281_v23 = vld [vmem:[#allocation2 + $0x2f] sm:$0xff]  ;;  %v1993_v24 = vpack.i.bf16 %v1285_v21, %v1284_v20 }
 0x74e   :  { %v1988_v25 = vpack.i.bf16 %v1281_v23, %v1280_v22  ;;  %v1288_v26 = vld [vmem:[#allocation2 + $0x29] sm:$0xff]  ;;  %v1289_v27 = vld [vmem:[#allocation2 + $0x31] sm:$0xff] }
 0x74f   :  { %v1998_v28 = vpack.i.bf16 %v1289_v27, %v1288_v26  ;;  %v1292_v44 = vld [vmem:[#allocation2 + $0x2a] sm:$0xff]  ;;  %v1293_v45 = vld [vmem:[#allocation2 + $0x32] sm:$0xff] }
 0x750   :  { %1989 = vrot.lane.b32.xlu1 %v1988_v25, %s2079_s0  ;;  %v1277_v56 = vld [vmem:[#allocation2 + $0x2e] sm:$0xff]  ;;  %v1357_v57 = vpack.c.bf16 %v1293_v45, %v1292_v44 }
 0x751   :  { %1994 = vrot.lane.b32.xlu0 %v1993_v24, %s2081_s6 }
 0x754   :  { %1999 = vrot.lane.b32.xlu1 %v1998_v28, %s2080_s5 }
 0x7ba   :  { %v1980_v29 = vpop.permute.xlu1 %1979 }
 0x7bb   :  { %v1975_v30 = vpop.permute.xlu0 %1974  ;;  %v1982_v33 = vunpack.i.h.bf16 %v1980_v29  ;;  %v1981_v34 = vunpack.i.l.bf16 %v1980_v29 }
 0x7bc   :  { %v1977_v31 = vunpack.i.h.bf16 %v1975_v30  ;;  %v1976_v32 = vunpack.i.l.bf16 %v1975_v30 }
 0x7be   :  { %v1342_v37 = vsel %vm18_vm0, %v1274_v35, %v1976_v32  ;;  %v1343_v38 = vsel %vm18_vm0, %v1275_v36, %v1977_v31 }
 0x7bf   :  { %v1985_v39 = vpop.permute.xlu0 %1984  ;;  %v1346_v42 = vsel %vm103_vm1, %v1342_v37, %v1981_v34  ;;  %v1347_v43 = vsel %vm103_vm1, %v1343_v38, %v1982_v33  ;;  %v1789_v34 = vld [vmem:[%s2546_s3 + $0xc] ss:$0 sm:$0xff] }
 0x7c0   :  { %v1987_v40 = vunpack.i.h.bf16 %v1985_v39  ;;  %v1986_v41 = vunpack.i.l.bf16 %v1985_v39 }
 0x7c2   :  { %v1350_v46 = vsel %vm108_vm2, %v1346_v42, %v1986_v41  ;;  %v1351_v47 = vsel %vm108_vm2, %v1347_v43, %v1987_v40  ;;  %v1990_v48 = vpop.permute.xlu1 %1989 }
 0x7c3   :  { %v1354_v49 = vpack.c.bf16 %v1351_v47, %v1350_v46  ;;  %v1995_v50 = vpop.permute.xlu0 %1994  ;;  %v1992_v51 = vunpack.i.h.bf16 %v1990_v48  ;;  %v1991_v52 = vunpack.i.l.bf16 %v1990_v48 }
 0x7c4   :  { %v1997_v53 = vunpack.i.h.bf16 %v1995_v50  ;;  %v1996_v54 = vunpack.i.l.bf16 %v1995_v50 }
 0x7c5   :  { %v1344_v58 = vsel %vm18_vm0, %v1276_v55, %v1991_v52  ;;  %v1345_v60 = vsel %vm18_vm0, %v1277_v56, %v1992_v51  ;;  %1478 = vmatmul.mubr.bf16.vlgmr.msra.gmra.mxu1 %v1354_v49 }
 0x7c6   :  { %1782 = vmatprep.mubr.msk.bf16.mxu1 %vm18_vm0, %v1357_v57  ;;  %v2000_v61 = vpop.permute.xlu1 %1999  ;;  %v1348_v1 = vsel %vm103_vm1, %v1344_v58, %v1996_v54  ;;  %v1349_v3 = vsel %vm103_vm1, %v1345_v60, %v1997_v53 }
 0x7c7   :  { %v2002_v63 = vunpack.i.h.bf16 %v2000_v61  ;;  %v2001_v0 = vunpack.i.l.bf16 %v2000_v61 }
 0x7c9   :  { %v1352_v5 = vsel %vm108_vm2, %v1348_v1, %v2001_v0  ;;  %v1353_v6 = vsel %vm108_vm2, %v1349_v3, %v2002_v63 }
 0x7ca   :  { %v1356_v8 = vpack.c.bf16 %v1353_v6, %v1352_v5 }
 0x7cd   :  { %1486 = vmatmul.mubr.bf16.gmra.mxu1 %v1356_v8 }
 0x885   :  { %v1479_v59 = vpop.f32.mrf.mxu1 }
 0x886   :  { %v1500_v13 = vmul.f32 %v1783_v11, %v1479_v59 }
 0x887   :  { %v1481_v62 = vpop.f32.mrf.mxu1 }
 0x888   :  { %v1508_v14 = vadd.f32 %v1784_v12, %v1500_v13 }
 0x889   :  { %v1482_v2 = vpop.f32.mrf.mxu1 }
 0x88a   :  { %v1501_v7 = vmul.f32 %v1783_v11, %v1482_v2  ;;  %v1516_v4 = vmul.f32 0.2, %v1508_v14  ;;  %vm1512_vm1 = vcmp.gt.f32.partialorder %v1508_v14, 0.0 }
 0x88b   :  { %v1484_v15 = vpop.f32.mrf.mxu1 }
 0x88c   :  { %v1509_v16 = vadd.f32 %v1784_v12, %v1501_v7  ;;  %v1520_v21 = vsel %vm1512_vm1, %v1508_v14, %v1516_v4 }
 0x88d   :  { %v1487_v17 = vpop.f32.mrf.mxu1 }
 0x88e   :  { %vm1513_vm2 = vcmp.gt.f32.partialorder %v1509_v16, 0.0  ;;  %v1517_v18 = vmul.f32 0.2, %v1509_v16  ;;  %v1502_v19 = vmul.f32 %v1783_v11, %v1487_v17 }
 0x88f   :  { %v1489_v20 = vpop.f32.mrf.mxu1 }
 0x890   :  { %v1521_v22 = vsel %vm1513_vm2, %v1509_v16, %v1517_v18  ;;  %v1510_v23 = vadd.f32 %v1784_v12, %v1502_v19 }
 0x891   :  { %v1490_v24 = vpop.f32.mrf.mxu1  ;;  %v1529_v25 = vpack.c.bf16 %v1521_v22, %v1520_v21 }
 0x892   :  { %v1503_v26 = vmul.f32 %v1783_v11, %v1490_v24  ;;  %v1518_v28 = vmul.f32 0.2, %v1510_v23  ;;  %vm1514_vm6 = vcmp.gt.f32.partialorder %v1510_v23, 0.0 }
 0x893   :  { %v1492_v27 = vpop.f32.mrf.mxu1  ;;  %1874 = vmatprep.mubr.msk.bf16.mxu0 %vm18_vm0, %v1529_v25 }
 0x894   :  { %v1511_v29 = vadd.f32 %v1784_v12, %v1503_v26  ;;  %v1522_v31 = vsel %vm1514_vm6, %v1510_v23, %v1518_v28 }
 0x896   :  { %vm1515_vm7 = vcmp.gt.f32.partialorder %v1511_v29, 0.0  ;;  %v1519_v30 = vmul.f32 0.2, %v1511_v29 }
 0x898   :  { %v1523_v32 = vsel %vm1515_vm7, %v1511_v29, %v1519_v30 }
 0x899   :  { %v1530_v33 = vpack.c.bf16 %v1523_v32, %v1522_v31 }
 0x89b   :  { %1875 = vmatmul.mubr.msk.bf16.vlgmr.msra.gmra.mxu0 %vm18_vm0, %v1530_v33 }
 0x95b   :  { %v1876_v35 = vpop.f32.mrf.mxu0 }
 0x95c   :  { %v1597_v36 = vadd.f32 %v1876_v35, %v1789_v34 }
 0x95d   :  { %v1588_v37 = vpop.f32.mrf.mxu0 }
 0x95e   :  { %1608 = vst [vmem:[%s2548_s4 + $0x28] sm:$0xff] %v1597_v36  ;;  %v1589_v38 = vadd.f32 %v1789_v34, %v1588_v37 }
 0x95f   :  { %v1877_v39 = vpop.f32.mrf.mxu0 }
 0x960   :  { %1604 = vst [vmem:[%s2548_s4 + $0x8] sm:$0xff] %v1589_v38  ;;  %v1600_v40 = vadd.f32 %v1877_v39, %v1789_v34 }
 0x961   :  { %v1591_v41 = vpop.f32.mrf.mxu0 }
 0x962   :  { %1610 = vst [vmem:[%s2548_s4 + $0x38] sm:$0xff] %v1600_v40  ;;  %v1592_v42 = vadd.f32 %v1789_v34, %v1591_v41 }
 0x964   :  { %1606 = vst [vmem:[%s2548_s4 + $0x18] sm:$0xff] %v1592_v42 }

</bundles_post_ra>
